<compile_context>
chip_gen: v5e
topology: v5e:2x2
jax: 0.10.0
libtpu: 0.0.40
codegen_flags: <defaults>
</compile_context>

<pallas_src>
import functools
import math

import jax
import jax.numpy as jnp
from jax.experimental import pallas as pl
from jax.experimental.pallas import tpu as pltpu


# ------------------------------------------------------------------ utilities
def get_time_embedding(time_steps, temb_dim):
    assert temb_dim % 2 == 0
    half = temb_dim // 2
    factor = 10000.0 ** (jnp.arange(half, dtype=jnp.float32) / half)
    t_emb = time_steps.astype(jnp.float32)[:, None] / factor[None, :]
    return jnp.concatenate([jnp.sin(t_emb), jnp.cos(t_emb)], axis=-1)


def _pick_tile(dim, candidates):
    """Largest candidate tile that divides dim, else the full dim (no pipelining)."""
    for c in candidates:
        if dim >= c and dim % c == 0:
            return c
    return dim


# ------------------------------------------------------------------ Pallas kernels
def _dense_kernel(x_ref, w_ref, b_ref, o_ref, acc_ref, *, pre_act, post_act):
    """(M,K) @ (K,N) with K-tiled f32 accumulation; optional SiLU prologue / act epilogue."""
    kidx = pl.program_id(2)

    @pl.when(kidx == 0)
    def _init():
        acc_ref[...] = jnp.zeros_like(acc_ref)

    x = x_ref[...].astype(jnp.float32)
    if pre_act == "silu":
        x = x * jax.nn.sigmoid(x)
    acc_ref[...] += jnp.dot(x.astype(w_ref.dtype), w_ref[...],
                            preferred_element_type=jnp.float32)

    @pl.when(kidx == pl.num_programs(2) - 1)
    def _fin():
        y = acc_ref[...] + b_ref[...].astype(jnp.float32)
        if post_act == "silu":
            y = y * jax.nn.sigmoid(y)
        elif post_act == "gelu":
            y = jax.nn.gelu(y, approximate=True)
        o_ref[...] = y.astype(o_ref.dtype)


def _ln_mod_mm_kernel(x_ref, sc_ref, sh_ref, w_ref, b_ref, o_ref, *, post_act, eps):
    """Fused LayerNorm(no affine) + adaLN modulate + matmul (+ optional GELU)."""
    x = x_ref[0].astype(jnp.float32)                       # (TS, D)
    mu = jnp.mean(x, axis=-1, keepdims=True)
    var = jnp.mean(jnp.square(x - mu), axis=-1, keepdims=True)
    xn = (x - mu) * jax.lax.rsqrt(var + eps)
    sc = sc_ref[0].astype(jnp.float32)                     # (1, D) broadcast over rows
    sh = sh_ref[0].astype(jnp.float32)
    h = xn * (1.0 + sc) + sh
    y = jnp.dot(h.astype(w_ref.dtype), w_ref[...],
                preferred_element_type=jnp.float32) + b_ref[...].astype(jnp.float32)
    if post_act == "gelu":
        y = jax.nn.gelu(y, approximate=True)
    o_ref[0] = y.astype(o_ref.dtype)


def _mm_gate_res_kernel(x_ref, w_ref, b_ref, g_ref, r_ref, o_ref, acc_ref):
    """Fused matmul (K-tiled, f32 acc) + bias + gated residual: out = res + gate * y."""
    kidx = pl.program_id(3)

    @pl.when(kidx == 0)
    def _init():
        acc_ref[...] = jnp.zeros_like(acc_ref)

    acc_ref[...] += jnp.dot(x_ref[0].astype(w_ref.dtype), w_ref[...],
                            preferred_element_type=jnp.float32)

    @pl.when(kidx == pl.num_programs(3) - 1)
    def _fin():
        y = acc_ref[...] + b_ref[...].astype(jnp.float32)
        g = g_ref[0].astype(jnp.float32)                   # (1, TN)
        o_ref[0] = (r_ref[0].astype(jnp.float32) + g * y).astype(o_ref.dtype)


def _attn_kernel(qkv_ref, o_ref, *, num_heads, head_dim, scale):
    """All heads of one batch row per grid step; head-major layout; lane-dense output."""
    att = num_heads * head_dim
    qkv = qkv_ref[0]                                       # (S, 3*att) f32
    for h in range(num_heads):
        q = qkv[:, h * head_dim:(h + 1) * head_dim].astype(jnp.bfloat16)
        k = qkv[:, att + h * head_dim:att + (h + 1) * head_dim].astype(jnp.bfloat16)
        v = qkv[:, 2 * att + h * head_dim:2 * att + (h + 1) * head_dim].astype(jnp.bfloat16)
        # contract last dims of q and k directly (no transpose materialized)
        s = jax.lax.dot_general(q, k, (((1,), (1,)), ((), ())),
                                preferred_element_type=jnp.float32) * scale
        s = s - jnp.max(s, axis=-1, keepdims=True)
        p = jnp.exp(s)
        l = jnp.sum(p, axis=-1, keepdims=True)
        p = p * pl.reciprocal(l, approx=True)              # EUP slot, ~free
        out_h = jnp.dot(p.astype(jnp.bfloat16), v, preferred_element_type=jnp.float32)
        o_ref[0, :, h * head_dim:(h + 1) * head_dim] = out_h.astype(o_ref.dtype)


# ------------------------------------------------------------------ op wrappers
def dense_op(x, w, b, pre_act=None, post_act=None, use_pallas=True):
    """y = post_act( pre_act(x) @ w + b ); x:(M,K) f32, w:(K,N) bf16, b:(1,N) f32."""
    M, K = x.shape
    N = w.shape[1]
    if not use_pallas:
        xx = x * jax.nn.sigmoid(x) if pre_act == "silu" else x
        y = jnp.dot(xx.astype(w.dtype), w, preferred_element_type=jnp.float32) + b
        if post_act == "silu":
            y = y * jax.nn.sigmoid(y)
        elif post_act == "gelu":
            y = jax.nn.gelu(y, approximate=True)
        return y
    TM = _pick_tile(M, (256, 128, 64, 32, 16, 8))
    TN = _pick_tile(N, (512, 256, 128))
    TK = _pick_tile(K, (1024, 512, 256))
    return pl.pallas_call(
        functools.partial(_dense_kernel, pre_act=pre_act, post_act=post_act),
        out_shape=jax.ShapeDtypeStruct((M, N), jnp.float32),
        grid=(M // TM, N // TN, K // TK),
        in_specs=[
            pl.BlockSpec((TM, TK), lambda i, j, k: (i, k)),
            pl.BlockSpec((TK, TN), lambda i, j, k: (k, j)),
            pl.BlockSpec((1, TN), lambda i, j, k: (0, j)),
        ],
        out_specs=pl.BlockSpec((TM, TN), lambda i, j, k: (i, j)),
        scratch_shapes=[pltpu.VMEM((TM, TN), jnp.float32)],
        compiler_params=pltpu.CompilerParams(
            dimension_semantics=("parallel", "parallel", "arbitrary")),
    )(x, w, b)


def ln_mod_matmul_op(x, scale, shift, w, b, post_act=None, eps=1e-6, use_pallas=True):
    """x:(Nb,S,D) f32; scale,shift:(Nb,1,D); w:(D,Nout) bf16; b:(1,Nout) -> (Nb,S,Nout)."""
    Nb, S, D = x.shape
    Nout = w.shape[1]
    if not use_pallas:
        mu = jnp.mean(x, axis=-1, keepdims=True)
        var = jnp.mean(jnp.square(x - mu), axis=-1, keepdims=True)
        xn = (x - mu) * jax.lax.rsqrt(var + eps)
        h = xn * (1.0 + scale) + shift
        y = jnp.einsum("nsd,dm->nsm", h.astype(w.dtype), w,
                       preferred_element_type=jnp.float32) + b[None]
        if post_act == "gelu":
            y = jax.nn.gelu(y, approximate=True)
        return y
    TS = _pick_tile(S, (512, 256, 128))
    TN = _pick_tile(Nout, (512, 256, 128))
    return pl.pallas_call(
        functools.partial(_ln_mod_mm_kernel, post_act=post_act, eps=eps),
        out_shape=jax.ShapeDtypeStruct((Nb, S, Nout), jnp.float32),
        grid=(Nb, S // TS, Nout // TN),
        in_specs=[
            pl.BlockSpec((1, TS, D), lambda n, s, j: (n, s, 0)),
            pl.BlockSpec((1, 1, D), lambda n, s, j: (n, 0, 0)),
            pl.BlockSpec((1, 1, D), lambda n, s, j: (n, 0, 0)),
            pl.BlockSpec((D, TN), lambda n, s, j: (0, j)),
            pl.BlockSpec((1, TN), lambda n, s, j: (0, j)),
        ],
        out_specs=pl.BlockSpec((1, TS, TN), lambda n, s, j: (n, s, j)),
        compiler_params=pltpu.CompilerParams(
            dimension_semantics=("parallel", "parallel", "parallel")),
    )(x, scale, shift, w, b)


def matmul_gate_res_op(x, w, b, gate, res, use_pallas=True):
    """out = res + gate * (x @ w + b); x:(Nb,S,K), gate:(Nb,1,Dout), res:(Nb,S,Dout)."""
    Nb, S, K = x.shape
    Dout = w.shape[1]
    if not use_pallas:
        y = jnp.einsum("nsk,km->nsm", x.astype(w.dtype), w,
                       preferred_element_type=jnp.float32) + b[None]
        return res + gate * y
    TS = _pick_tile(S, (512, 256, 128))
    TN = _pick_tile(Dout, (512, 256, 128))
    TK = _pick_tile(K, (1024, 512, 256))
    return pl.pallas_call(
        _mm_gate_res_kernel,
        out_shape=jax.ShapeDtypeStruct((Nb, S, Dout), jnp.float32),
        grid=(Nb, S // TS, Dout // TN, K // TK),
        in_specs=[
            pl.BlockSpec((1, TS, TK), lambda n, s, j, k: (n, s, k)),
            pl.BlockSpec((TK, TN), lambda n, s, j, k: (k, j)),
            pl.BlockSpec((1, TN), lambda n, s, j, k: (0, j)),
            pl.BlockSpec((1, 1, TN), lambda n, s, j, k: (n, 0, j)),
            pl.BlockSpec((1, TS, TN), lambda n, s, j, k: (n, s, j)),
        ],
        out_specs=pl.BlockSpec((1, TS, TN), lambda n, s, j, k: (n, s, j)),
        scratch_shapes=[pltpu.VMEM((TS, TN), jnp.float32)],
        compiler_params=pltpu.CompilerParams(
            dimension_semantics=("parallel", "parallel", "parallel", "arbitrary")),
    )(x, w, b, gate, res)


def attention_op(qkv, num_heads, head_dim, use_pallas=True):
    """qkv:(Nb,S,3*att) head-major -> (Nb,S,att) attention output (head-major)."""
    Nb, S, _ = qkv.shape
    att = num_heads * head_dim
    scale = 1.0 / math.sqrt(head_dim)
    if not use_pallas:
        q = qkv[..., :att].reshape(Nb, S, num_heads, head_dim).astype(jnp.bfloat16)
        k = qkv[..., att:2 * att].reshape(Nb, S, num_heads, head_dim).astype(jnp.bfloat16)
        v = qkv[..., 2 * att:].reshape(Nb, S, num_heads, head_dim).astype(jnp.bfloat16)
        s = jnp.einsum("bqhd,bkhd->bhqk", q, k, preferred_element_type=jnp.float32) * scale
        s = s - jnp.max(s, axis=-1, keepdims=True)
        p = jnp.exp(s)
        p = p / jnp.sum(p, axis=-1, keepdims=True)
        o = jnp.einsum("bhqk,bkhd->bqhd", p.astype(jnp.bfloat16), v,
                       preferred_element_type=jnp.float32)
        return o.reshape(Nb, S, att)
    return pl.pallas_call(
        functools.partial(_attn_kernel, num_heads=num_heads, head_dim=head_dim,
                          scale=scale),
        out_shape=jax.ShapeDtypeStruct((Nb, S, att), jnp.float32),
        grid=(Nb,),
        in_specs=[pl.BlockSpec((1, S, 3 * att), lambda n: (n, 0, 0))],
        out_specs=pl.BlockSpec((1, S, att), lambda n: (n, 0, 0)),
        compiler_params=pltpu.CompilerParams(dimension_semantics=("parallel",)),
    )(qkv)


# ------------------------------------------------------------------ DiT block
def transformer_layer(p, x, cond, num_heads, head_dim, use_pallas):
    """x: (Nb, S, D) f32, cond: (Nb, D) f32 -> (Nb, S, D) f32."""
    ada = dense_op(cond, p["ada_w"], p["ada_b"], pre_act="silu", use_pallas=use_pallas)
    (pre_attn_shift, pre_attn_scale, post_attn_gate,
     pre_mlp_shift, pre_mlp_scale, post_mlp_gate) = [
        c[:, None, :] for c in jnp.split(ada, 6, axis=1)]          # each (Nb, 1, D)

    # --- attention branch: LN + modulate fused into qkv matmul, gated residual into o-proj
    qkv = ln_mod_matmul_op(x, pre_attn_scale, pre_attn_shift,
                           p["qkv_w"], p["qkv_b"], use_pallas=use_pallas)
    attn = attention_op(qkv, num_heads, head_dim, use_pallas=use_pallas)
    x = matmul_gate_res_op(attn, p["o_w"], p["o_b"], post_attn_gate, x,
                           use_pallas=use_pallas)

    # --- MLP branch: LN + modulate + GELU fused into fc1, gated residual into fc2
    h = ln_mod_matmul_op(x, pre_mlp_scale, pre_mlp_shift,
                         p["fc1_w"], p["fc1_b"], post_act="gelu", use_pallas=use_pallas)
    x = matmul_gate_res_op(h, p["fc2_w"], p["fc2_b"], post_mlp_gate, x,
                           use_pallas=use_pallas)
    return x


# ------------------------------------------------------------------ full forward
def dit_video_forward(params, x, t, cfg, num_images=0, use_pallas=True):
    B, F, C, H, W = x.shape
    ph, pw = cfg["ph"], cfg["pw"]
    nh, nw = H // ph, W // pw
    P = nh * nw
    D = cfg["hidden"]
    nH, hd = cfg["num_heads"], cfg["head_dim"]
    BF = B * F

    # patch embedding: 'b c (nh ph) (nw pw) -> b (nh nw) (ph pw c)' then Linear(+pos)
    xf = x.reshape(BF, C, H, W)
    patches = xf.reshape(BF, C, nh, ph, nw, pw).transpose(0, 2, 4, 3, 5, 1)
    patches = patches.reshape(BF * P, ph * pw * C)
    out = dense_op(patches, params["patch_w"], params["patch_b"], use_pallas=use_pallas)
    out = out.reshape(BF, P, D) + params["pos_emb"][None]

    # timestep conditioning
    t_emb = get_time_embedding(t.astype(jnp.float32), cfg["temb_dim"])
    t_emb = dense_op(t_emb, params["t1_w"], params["t1_b"], post_act="silu",
                     use_pallas=use_pallas)
    t_emb = dense_op(t_emb, params["t2_w"], params["t2_b"], use_pallas=use_pallas)
    Ftot = F + num_images
    t_emb_spatial = jnp.repeat(t_emb, Ftot, axis=0)   # (B*Ftot, D), small
    t_emb_temporal = jnp.repeat(t_emb, P, axis=0)     # (B*P, D), small
    frame_emb = get_time_embedding(jnp.arange(cfg["F"], dtype=jnp.float32), D)

    # alternating spatial / temporal blocks
    # (the (b f) p <-> (b p) f rearranges are inherent to Latte; done by XLA)
    for li in range(0, cfg["num_layers"], 2):
        out = transformer_layer(params["layers"][li], out, t_emb_spatial, nH, hd,
                                use_pallas)
        out = out.reshape(B, Ftot, P, D).transpose(0, 2, 1, 3).reshape(B * P, Ftot, D)
        out_video = out[:, :cfg["F"], :]
        out_images = out[:, cfg["F"]:, :]
        if li == 0:
            out_video = out_video + frame_emb[None]
        out_video = transformer_layer(params["layers"][li + 1], out_video,
                                      t_emb_temporal, nH, hd, use_pallas)
        out = jnp.concatenate([out_video, out_images], axis=1)
        out = out.reshape(B, P, Ftot, D).transpose(0, 2, 1, 3).reshape(B * Ftot, P, D)

    # final adaLN modulation fused with the output projection
    ada = dense_op(t_emb_spatial, params["ada_w"], params["ada_b"], pre_act="silu",
                   use_pallas=use_pallas)
    pre_mlp_shift, pre_mlp_scale = jnp.split(ada, 2, axis=1)
    out2 = ln_mod_matmul_op(out, pre_mlp_scale[:, None, :], pre_mlp_shift[:, None, :],
                            params["proj_w"], params["proj_b"], eps=1e-6,
                            use_pallas=use_pallas)          # (BF, P, ph*pw*C)

    # 'b (nh nw) (ph pw c) -> b c (nh ph) (nw pw)'
    out3 = out2.reshape(BF, nh, nw, ph, pw, C).transpose(0, 5, 1, 3, 2, 4)
    out3 = out3.reshape(BF, C, H, W)
    return out3.reshape(B, F, C, H, W)


# ------------------------------------------------------------------ params
def init_params(key, cfg):
    D = cfg["hidden"]
    C, ph, pw = cfg["C"], cfg["ph"], cfg["pw"]
    P = (cfg["H"] // ph) * (cfg["W"] // pw)
    att = cfg["num_heads"] * cfg["head_dim"]
    patch_dim = ph * pw * C
    std = 0.02
    keys = iter(jax.random.split(key, 256))

    def w(shape):  # matmul weights stored in bf16 (halves weight HBM traffic / MXU bf16)
        return (std * jax.random.normal(next(keys), shape, jnp.float32)).astype(jnp.bfloat16)

    def b(n):      # biases stay f32 (added to the f32 accumulator)
        return std * jax.random.normal(next(keys), (1, n), jnp.float32)

    params = dict(
        patch_w=w((patch_dim, D)), patch_b=b(D),
        pos_emb=get_time_embedding(jnp.arange(P, dtype=jnp.float32), D),
        t1_w=w((cfg["temb_dim"], D)), t1_b=b(D),
        t2_w=w((D, D)), t2_b=b(D),
        ada_w=w((D, 2 * D)), ada_b=b(2 * D),
        proj_w=w((D, patch_dim)), proj_b=b(patch_dim),
        layers=[],
    )
    for _ in range(cfg["num_layers"]):
        params["layers"].append(dict(
            ada_w=w((D, 6 * D)), ada_b=b(6 * D),
            qkv_w=w((D, 3 * att)), qkv_b=b(3 * att),
            o_w=w((att, D)), o_b=b(D),
            fc1_w=w((D, 4 * D)), fc1_b=b(4 * D),
            fc2_w=w((4 * D, D)), fc2_b=b(D),
        ))
    return params


# ------------------------------------------------------------------ main
if __name__ == "__main__":
    cfg = dict(B=2, F=4, C=4, H=16, W=16, ph=8, pw=8,
               hidden=32, num_layers=2, num_heads=2, head_dim=16, temb_dim=32)

    key = jax.random.PRNGKey(0)
    kp, kx, kt = jax.random.split(key, 3)
    params = init_params(kp, cfg)
    x = jax.random.normal(kx, (cfg["B"], cfg["F"], cfg["C"], cfg["H"], cfg["W"]),
                          jnp.float32)
    t = jax.random.randint(kt, (cfg["B"],), 0, 1000)

    fwd = jax.jit(functools.partial(dit_video_forward, cfg=cfg, use_pallas=True))
    out = jax.block_until_ready(fwd(params, x, t))

    ref = dit_video_forward(params, x, t, cfg=cfg, use_pallas=False)
    assert out.shape == (cfg["B"], cfg["F"], cfg["C"], cfg["H"], cfg["W"])
    assert jnp.all(jnp.isfinite(out))
    assert jnp.allclose(out, ref, atol=2e-3, rtol=2e-3), \
        f"mismatch: max abs err {float(jnp.max(jnp.abs(out - ref)))}"
    print("KERNEL_OK")
</pallas_src>

<mosaic_0001>
module attributes {stable_mosaic.version = 11 : i64} {
  func.func @_dense_kernel(%arg0: i32, %arg1: i32, %arg2: i32, %arg3: memref<32x256xf32, #tpu.memory_space<vmem>>, %arg4: memref<256x32xbf16, #tpu.memory_space<vmem>>, %arg5: memref<1x32xf32, #tpu.memory_space<vmem>>, %arg6: memref<32x32xf32, #tpu.memory_space<vmem>>, %arg7: memref<32x32xf32, #tpu.memory_space<vmem>>) attributes {dimension_semantics = [#tpu.dimension_semantics<parallel>, #tpu.dimension_semantics<parallel>, #tpu.dimension_semantics<arbitrary>], iteration_bounds = array<i64: 1, 1, 1>, scalar_prefetch = 0 : i64, scratch_operands = 1 : i64, tpu.core_type = #tpu.core_type<tc>, window_params = [{transform_indices = @transform_0, window_bounds = array<i64: 32, 256>}, {transform_indices = @transform_1, window_bounds = array<i64: 256, 32>}, {transform_indices = @transform_2, window_bounds = array<i64: 1, 32>}, {transform_indices = @transform_3, window_bounds = array<i64: 32, 32>}]} {
    %c0_i32 = arith.constant 0 : i32
    %0 = arith.cmpi eq, %arg2, %c0_i32 : i32
    %1 = arith.extui %0 : i1 to i32
    %c0_i32_0 = arith.constant 0 : i32
    %2 = arith.cmpi ne, %1, %c0_i32_0 : i32
    scf.if %2 {
      %cst_10 = arith.constant 0.000000e+00 : f32
      %13 = vector.broadcast %cst_10 : f32 to vector<32x32xf32>
      %c0_11 = arith.constant 0 : index
      %c0_12 = arith.constant 0 : index
      %14 = vector.load %arg7[%c0_11, %c0_12] : memref<32x32xf32, #tpu.memory_space<vmem>>, vector<32x32xf32>
      tpu.vector_store %arg7[%c0_11, %c0_12], %13 {strides = array<i32>} : memref<32x32xf32, #tpu.memory_space<vmem>>, vector<32x32xf32>,
    } else {
    }
    %c0 = arith.constant 0 : index
    %c0_1 = arith.constant 0 : index
    %3 = vector.load %arg3[%c0, %c0_1] : memref<32x256xf32, #tpu.memory_space<vmem>>, vector<32x256xf32>
    %c0_2 = arith.constant 0 : index
    %c0_3 = arith.constant 0 : index
    %4 = vector.load %arg7[%c0_2, %c0_3] : memref<32x32xf32, #tpu.memory_space<vmem>>, vector<32x32xf32>
    %5 = arith.truncf %3 : vector<32x256xf32> to vector<32x256xbf16>
    %c0_4 = arith.constant 0 : index
    %c0_5 = arith.constant 0 : index
    %6 = vector.load %arg4[%c0_4, %c0_5] : memref<256x32xbf16, #tpu.memory_space<vmem>>, vector<256x32xbf16>
    %cst = arith.constant dense<0.000000e+00> : vector<32x32xf32>
    %7 = tpu.matmul %5, %6, %cst {dimension_numbers = #tpu.dot_dimension_numbers<[1], [0], [0], [1], [0, 0, 1, 1], [], []>} : vector<32x256xbf16>, vector<256x32xbf16>, vector<32x32xf32> -> vector<32x32xf32>
    %8 = arith.addf %4, %7 : vector<32x32xf32>
    %c0_6 = arith.constant 0 : index
    %c0_7 = arith.constant 0 : index
    %9 = vector.load %arg7[%c0_6, %c0_7] : memref<32x32xf32, #tpu.memory_space<vmem>>, vector<32x32xf32>
    tpu.vector_store %arg7[%c0_6, %c0_7], %8 {strides = array<i32>} : memref<32x32xf32, #tpu.memory_space<vmem>>, vector<32x32xf32>,
    %c0_i32_8 = arith.constant 0 : i32
    %10 = arith.cmpi eq, %arg2, %c0_i32_8 : i32
    %11 = arith.extui %10 : i1 to i32
    %c0_i32_9 = arith.constant 0 : i32
    %12 = arith.cmpi ne, %11, %c0_i32_9 : i32
    scf.if %12 {
      %c0_10 = arith.constant 0 : index
      %c0_11 = arith.constant 0 : index
      %13 = vector.load %arg7[%c0_10, %c0_11] : memref<32x32xf32, #tpu.memory_space<vmem>>, vector<32x32xf32>
      %c0_12 = arith.constant 0 : index
      %c0_13 = arith.constant 0 : index
      %14 = vector.load %arg5[%c0_12, %c0_13] : memref<1x32xf32, #tpu.memory_space<vmem>>, vector<1x32xf32>
      %15 = vector.broadcast %14 : vector<1x32xf32> to vector<32x32xf32>
      %16 = arith.addf %13, %15 : vector<32x32xf32>
      %c0_14 = arith.constant 0 : index
      %c0_15 = arith.constant 0 : index
      %17 = vector.load %arg6[%c0_14, %c0_15] : memref<32x32xf32, #tpu.memory_space<vmem>>, vector<32x32xf32>
      tpu.vector_store %arg6[%c0_14, %c0_15], %16 {strides = array<i32>} : memref<32x32xf32, #tpu.memory_space<vmem>>, vector<32x32xf32>,
    } else {
    }
    return
  }
  func.func @transform_0(%arg0: i32, %arg1: i32, %arg2: i32) -> (i32, i32) {
    %c0_i32 = arith.constant 0 : i32
    return %arg0, %arg2 : i32, i32
  }
  func.func @transform_1(%arg0: i32, %arg1: i32, %arg2: i32) -> (i32, i32) {
    %c0_i32 = arith.constant 0 : i32
    return %arg2, %arg1 : i32, i32
  }
  func.func @transform_2(%arg0: i32, %arg1: i32, %arg2: i32) -> (i32, i32) {
    %c0_i32 = arith.constant 0 : i32
    %c0_i32_0 = arith.constant 0 : i32
    return %c0_i32, %arg1 : i32, i32
  }
  func.func @transform_3(%arg0: i32, %arg1: i32, %arg2: i32) -> (i32, i32) {
    %c0_i32 = arith.constant 0 : i32
    return %arg0, %arg1 : i32, i32
  }
}

module attributes {stable_mosaic.version = 11 : i64} {
  func.func @_dense_kernel(%arg0: i32, %arg1: i32, %arg2: i32, %arg3: memref<2x32xf32, #tpu.memory_space<vmem>>, %arg4: memref<32x32xbf16, #tpu.memory_space<vmem>>, %arg5: memref<1x32xf32, #tpu.memory_space<vmem>>, %arg6: memref<2x32xf32, #tpu.memory_space<vmem>>, %arg7: memref<2x32xf32, #tpu.memory_space<vmem>>) attributes {dimension_semantics = [#tpu.dimension_semantics<parallel>, #tpu.dimension_semantics<parallel>, #tpu.dimension_semantics<arbitrary>], iteration_bounds = array<i64: 1, 1, 1>, scalar_prefetch = 0 : i64, scratch_operands = 1 : i64, tpu.core_type = #tpu.core_type<tc>, window_params = [{transform_indices = @transform_0, window_bounds = array<i64: 2, 32>}, {transform_indices = @transform_1, window_bounds = array<i64: 32, 32>}, {transform_indices = @transform_2, window_bounds = array<i64: 1, 32>}, {transform_indices = @transform_3, window_bounds = array<i64: 2, 32>}]} {
    %c0_i32 = arith.constant 0 : i32
    %0 = arith.cmpi eq, %arg2, %c0_i32 : i32
    %1 = arith.extui %0 : i1 to i32
    %c0_i32_0 = arith.constant 0 : i32
    %2 = arith.cmpi ne, %1, %c0_i32_0 : i32
    scf.if %2 {
      %cst_10 = arith.constant 0.000000e+00 : f32
      %13 = vector.broadcast %cst_10 : f32 to vector<2x32xf32>
      %c0_11 = arith.constant 0 : index
      %c0_12 = arith.constant 0 : index
      %14 = vector.load %arg7[%c0_11, %c0_12] : memref<2x32xf32, #tpu.memory_space<vmem>>, vector<2x32xf32>
      tpu.vector_store %arg7[%c0_11, %c0_12], %13 {strides = array<i32>} : memref<2x32xf32, #tpu.memory_space<vmem>>, vector<2x32xf32>,
    } else {
    }
    %c0 = arith.constant 0 : index
    %c0_1 = arith.constant 0 : index
    %3 = vector.load %arg3[%c0, %c0_1] : memref<2x32xf32, #tpu.memory_space<vmem>>, vector<2x32xf32>
    %c0_2 = arith.constant 0 : index
    %c0_3 = arith.constant 0 : index
    %4 = vector.load %arg7[%c0_2, %c0_3] : memref<2x32xf32, #tpu.memory_space<vmem>>, vector<2x32xf32>
    %5 = arith.truncf %3 : vector<2x32xf32> to vector<2x32xbf16>
    %c0_4 = arith.constant 0 : index
    %c0_5 = arith.constant 0 : index
    %6 = vector.load %arg4[%c0_4, %c0_5] : memref<32x32xbf16, #tpu.memory_space<vmem>>, vector<32x32xbf16>
    %cst = arith.constant dense<0.000000e+00> : vector<2x32xf32>
    %7 = tpu.matmul %5, %6, %cst {dimension_numbers = #tpu.dot_dimension_numbers<[1], [0], [0], [1], [0, 0, 1, 1], [], []>} : vector<2x32xbf16>, vector<32x32xbf16>, vector<2x32xf32> -> vector<2x32xf32>
    %8 = arith.addf %4, %7 : vector<2x32xf32>
    %c0_6 = arith.constant 0 : index
    %c0_7 = arith.constant 0 : index
    %9 = vector.load %arg7[%c0_6, %c0_7] : memref<2x32xf32, #tpu.memory_space<vmem>>, vector<2x32xf32>
    tpu.vector_store %arg7[%c0_6, %c0_7], %8 {strides = array<i32>} : memref<2x32xf32, #tpu.memory_space<vmem>>, vector<2x32xf32>,
    %c0_i32_8 = arith.constant 0 : i32
    %10 = arith.cmpi eq, %arg2, %c0_i32_8 : i32
    %11 = arith.extui %10 : i1 to i32
    %c0_i32_9 = arith.constant 0 : i32
    %12 = arith.cmpi ne, %11, %c0_i32_9 : i32
    scf.if %12 {
      %c0_10 = arith.constant 0 : index
      %c0_11 = arith.constant 0 : index
      %13 = vector.load %arg7[%c0_10, %c0_11] : memref<2x32xf32, #tpu.memory_space<vmem>>, vector<2x32xf32>
      %c0_12 = arith.constant 0 : index
      %c0_13 = arith.constant 0 : index
      %14 = vector.load %arg5[%c0_12, %c0_13] : memref<1x32xf32, #tpu.memory_space<vmem>>, vector<1x32xf32>
      %15 = vector.broadcast %14 : vector<1x32xf32> to vector<2x32xf32>
      %16 = arith.addf %13, %15 : vector<2x32xf32>
      %17 = arith.negf %16 : vector<2x32xf32>
      %18 = math.exp %17 : vector<2x32xf32>
      %cst_14 = arith.constant 1.000000e+00 : f32
      %19 = vector.broadcast %cst_14 : f32 to vector<2x32xf32>
      %20 = arith.addf %19, %18 : vector<2x32xf32>
      %21 = arith.divf %19, %20 : vector<2x32xf32>
      %22 = arith.mulf %16, %21 : vector<2x32xf32>
      %c0_15 = arith.constant 0 : index
      %c0_16 = arith.constant 0 : index
      %23 = vector.load %arg6[%c0_15, %c0_16] : memref<2x32xf32, #tpu.memory_space<vmem>>, vector<2x32xf32>
      tpu.vector_store %arg6[%c0_15, %c0_16], %22 {strides = array<i32>} : memref<2x32xf32, #tpu.memory_space<vmem>>, vector<2x32xf32>,
    } else {
    }
    return
  }
  func.func @transform_0(%arg0: i32, %arg1: i32, %arg2: i32) -> (i32, i32) {
    %c0_i32 = arith.constant 0 : i32
    return %arg0, %arg2 : i32, i32
  }
  func.func @transform_1(%arg0: i32, %arg1: i32, %arg2: i32) -> (i32, i32) {
    %c0_i32 = arith.constant 0 : i32
    return %arg2, %arg1 : i32, i32
  }
  func.func @transform_2(%arg0: i32, %arg1: i32, %arg2: i32) -> (i32, i32) {
    %c0_i32 = arith.constant 0 : i32
    %c0_i32_0 = arith.constant 0 : i32
    return %c0_i32, %arg1 : i32, i32
  }
  func.func @transform_3(%arg0: i32, %arg1: i32, %arg2: i32) -> (i32, i32) {
    %c0_i32 = arith.constant 0 : i32
    return %arg0, %arg1 : i32, i32
  }
}

module attributes {stable_mosaic.version = 11 : i64} {
  func.func @_dense_kernel(%arg0: i32, %arg1: i32, %arg2: i32, %arg3: memref<2x32xf32, #tpu.memory_space<vmem>>, %arg4: memref<32x32xbf16, #tpu.memory_space<vmem>>, %arg5: memref<1x32xf32, #tpu.memory_space<vmem>>, %arg6: memref<2x32xf32, #tpu.memory_space<vmem>>, %arg7: memref<2x32xf32, #tpu.memory_space<vmem>>) attributes {dimension_semantics = [#tpu.dimension_semantics<parallel>, #tpu.dimension_semantics<parallel>, #tpu.dimension_semantics<arbitrary>], iteration_bounds = array<i64: 1, 1, 1>, scalar_prefetch = 0 : i64, scratch_operands = 1 : i64, tpu.core_type = #tpu.core_type<tc>, window_params = [{transform_indices = @transform_0, window_bounds = array<i64: 2, 32>}, {transform_indices = @transform_1, window_bounds = array<i64: 32, 32>}, {transform_indices = @transform_2, window_bounds = array<i64: 1, 32>}, {transform_indices = @transform_3, window_bounds = array<i64: 2, 32>}]} {
    %c0_i32 = arith.constant 0 : i32
    %0 = arith.cmpi eq, %arg2, %c0_i32 : i32
    %1 = arith.extui %0 : i1 to i32
    %c0_i32_0 = arith.constant 0 : i32
    %2 = arith.cmpi ne, %1, %c0_i32_0 : i32
    scf.if %2 {
      %cst_10 = arith.constant 0.000000e+00 : f32
      %13 = vector.broadcast %cst_10 : f32 to vector<2x32xf32>
      %c0_11 = arith.constant 0 : index
      %c0_12 = arith.constant 0 : index
      %14 = vector.load %arg7[%c0_11, %c0_12] : memref<2x32xf32, #tpu.memory_space<vmem>>, vector<2x32xf32>
      tpu.vector_store %arg7[%c0_11, %c0_12], %13 {strides = array<i32>} : memref<2x32xf32, #tpu.memory_space<vmem>>, vector<2x32xf32>,
    } else {
    }
    %c0 = arith.constant 0 : index
    %c0_1 = arith.constant 0 : index
    %3 = vector.load %arg3[%c0, %c0_1] : memref<2x32xf32, #tpu.memory_space<vmem>>, vector<2x32xf32>
    %c0_2 = arith.constant 0 : index
    %c0_3 = arith.constant 0 : index
    %4 = vector.load %arg7[%c0_2, %c0_3] : memref<2x32xf32, #tpu.memory_space<vmem>>, vector<2x32xf32>
    %5 = arith.truncf %3 : vector<2x32xf32> to vector<2x32xbf16>
    %c0_4 = arith.constant 0 : index
    %c0_5 = arith.constant 0 : index
    %6 = vector.load %arg4[%c0_4, %c0_5] : memref<32x32xbf16, #tpu.memory_space<vmem>>, vector<32x32xbf16>
    %cst = arith.constant dense<0.000000e+00> : vector<2x32xf32>
    %7 = tpu.matmul %5, %6, %cst {dimension_numbers = #tpu.dot_dimension_numbers<[1], [0], [0], [1], [0, 0, 1, 1], [], []>} : vector<2x32xbf16>, vector<32x32xbf16>, vector<2x32xf32> -> vector<2x32xf32>
    %8 = arith.addf %4, %7 : vector<2x32xf32>
    %c0_6 = arith.constant 0 : index
    %c0_7 = arith.constant 0 : index
    %9 = vector.load %arg7[%c0_6, %c0_7] : memref<2x32xf32, #tpu.memory_space<vmem>>, vector<2x32xf32>
    tpu.vector_store %arg7[%c0_6, %c0_7], %8 {strides = array<i32>} : memref<2x32xf32, #tpu.memory_space<vmem>>, vector<2x32xf32>,
    %c0_i32_8 = arith.constant 0 : i32
    %10 = arith.cmpi eq, %arg2, %c0_i32_8 : i32
    %11 = arith.extui %10 : i1 to i32
    %c0_i32_9 = arith.constant 0 : i32
    %12 = arith.cmpi ne, %11, %c0_i32_9 : i32
    scf.if %12 {
      %c0_10 = arith.constant 0 : index
      %c0_11 = arith.constant 0 : index
      %13 = vector.load %arg7[%c0_10, %c0_11] : memref<2x32xf32, #tpu.memory_space<vmem>>, vector<2x32xf32>
      %c0_12 = arith.constant 0 : index
      %c0_13 = arith.constant 0 : index
      %14 = vector.load %arg5[%c0_12, %c0_13] : memref<1x32xf32, #tpu.memory_space<vmem>>, vector<1x32xf32>
      %15 = vector.broadcast %14 : vector<1x32xf32> to vector<2x32xf32>
      %16 = arith.addf %13, %15 : vector<2x32xf32>
      %c0_14 = arith.constant 0 : index
      %c0_15 = arith.constant 0 : index
      %17 = vector.load %arg6[%c0_14, %c0_15] : memref<2x32xf32, #tpu.memory_space<vmem>>, vector<2x32xf32>
      tpu.vector_store %arg6[%c0_14, %c0_15], %16 {strides = array<i32>} : memref<2x32xf32, #tpu.memory_space<vmem>>, vector<2x32xf32>,
    } else {
    }
    return
  }
  func.func @transform_0(%arg0: i32, %arg1: i32, %arg2: i32) -> (i32, i32) {
    %c0_i32 = arith.constant 0 : i32
    return %arg0, %arg2 : i32, i32
  }
  func.func @transform_1(%arg0: i32, %arg1: i32, %arg2: i32) -> (i32, i32) {
    %c0_i32 = arith.constant 0 : i32
    return %arg2, %arg1 : i32, i32
  }
  func.func @transform_2(%arg0: i32, %arg1: i32, %arg2: i32) -> (i32, i32) {
    %c0_i32 = arith.constant 0 : i32
    %c0_i32_0 = arith.constant 0 : i32
    return %c0_i32, %arg1 : i32, i32
  }
  func.func @transform_3(%arg0: i32, %arg1: i32, %arg2: i32) -> (i32, i32) {
    %c0_i32 = arith.constant 0 : i32
    return %arg0, %arg1 : i32, i32
  }
}

module attributes {stable_mosaic.version = 11 : i64} {
  func.func @_dense_kernel(%arg0: i32, %arg1: i32, %arg2: i32, %arg3: memref<8x32xf32, #tpu.memory_space<vmem>>, %arg4: memref<32x192xbf16, #tpu.memory_space<vmem>>, %arg5: memref<1x192xf32, #tpu.memory_space<vmem>>, %arg6: memref<8x192xf32, #tpu.memory_space<vmem>>, %arg7: memref<8x192xf32, #tpu.memory_space<vmem>>) attributes {dimension_semantics = [#tpu.dimension_semantics<parallel>, #tpu.dimension_semantics<parallel>, #tpu.dimension_semantics<arbitrary>], iteration_bounds = array<i64: 1, 1, 1>, scalar_prefetch = 0 : i64, scratch_operands = 1 : i64, tpu.core_type = #tpu.core_type<tc>, window_params = [{transform_indices = @transform_0, window_bounds = array<i64: 8, 32>}, {transform_indices = @transform_1, window_bounds = array<i64: 32, 192>}, {transform_indices = @transform_2, window_bounds = array<i64: 1, 192>}, {transform_indices = @transform_3, window_bounds = array<i64: 8, 192>}]} {
    %c0_i32 = arith.constant 0 : i32
    %0 = arith.cmpi eq, %arg2, %c0_i32 : i32
    %1 = arith.extui %0 : i1 to i32
    %c0_i32_0 = arith.constant 0 : i32
    %2 = arith.cmpi ne, %1, %c0_i32_0 : i32
    scf.if %2 {
      %cst_11 = arith.constant 0.000000e+00 : f32
      %19 = vector.broadcast %cst_11 : f32 to vector<8x192xf32>
      %c0_12 = arith.constant 0 : index
      %c0_13 = arith.constant 0 : index
      %20 = vector.load %arg7[%c0_12, %c0_13] : memref<8x192xf32, #tpu.memory_space<vmem>>, vector<8x192xf32>
      tpu.vector_store %arg7[%c0_12, %c0_13], %19 {strides = array<i32>} : memref<8x192xf32, #tpu.memory_space<vmem>>, vector<8x192xf32>,
    } else {
    }
    %c0 = arith.constant 0 : index
    %c0_1 = arith.constant 0 : index
    %3 = vector.load %arg3[%c0, %c0_1] : memref<8x32xf32, #tpu.memory_space<vmem>>, vector<8x32xf32>
    %4 = arith.negf %3 : vector<8x32xf32>
    %5 = math.exp %4 : vector<8x32xf32>
    %cst = arith.constant 1.000000e+00 : f32
    %6 = vector.broadcast %cst : f32 to vector<8x32xf32>
    %7 = arith.addf %6, %5 : vector<8x32xf32>
    %8 = arith.divf %6, %7 : vector<8x32xf32>
    %9 = arith.mulf %3, %8 : vector<8x32xf32>
    %c0_2 = arith.constant 0 : index
    %c0_3 = arith.constant 0 : index
    %10 = vector.load %arg7[%c0_2, %c0_3] : memref<8x192xf32, #tpu.memory_space<vmem>>, vector<8x192xf32>
    %11 = arith.truncf %9 : vector<8x32xf32> to vector<8x32xbf16>
    %c0_4 = arith.constant 0 : index
    %c0_5 = arith.constant 0 : index
    %12 = vector.load %arg4[%c0_4, %c0_5] : memref<32x192xbf16, #tpu.memory_space<vmem>>, vector<32x192xbf16>
    %cst_6 = arith.constant dense<0.000000e+00> : vector<8x192xf32>
    %13 = tpu.matmul %11, %12, %cst_6 {dimension_numbers = #tpu.dot_dimension_numbers<[1], [0], [0], [1], [0, 0, 1, 1], [], []>} : vector<8x32xbf16>, vector<32x192xbf16>, vector<8x192xf32> -> vector<8x192xf32>
    %14 = arith.addf %10, %13 : vector<8x192xf32>
    %c0_7 = arith.constant 0 : index
    %c0_8 = arith.constant 0 : index
    %15 = vector.load %arg7[%c0_7, %c0_8] : memref<8x192xf32, #tpu.memory_space<vmem>>, vector<8x192xf32>
    tpu.vector_store %arg7[%c0_7, %c0_8], %14 {strides = array<i32>} : memref<8x192xf32, #tpu.memory_space<vmem>>, vector<8x192xf32>,
    %c0_i32_9 = arith.constant 0 : i32
    %16 = arith.cmpi eq, %arg2, %c0_i32_9 : i32
    %17 = arith.extui %16 : i1 to i32
    %c0_i32_10 = arith.constant 0 : i32
    %18 = arith.cmpi ne, %17, %c0_i32_10 : i32
    scf.if %18 {
      %c0_11 = arith.constant 0 : index
      %c0_12 = arith.constant 0 : index
      %19 = vector.load %arg7[%c0_11, %c0_12] : memref<8x192xf32, #tpu.memory_space<vmem>>, vector<8x192xf32>
      %c0_13 = arith.constant 0 : index
      %c0_14 = arith.constant 0 : index
      %20 = vector.load %arg5[%c0_13, %c0_14] : memref<1x192xf32, #tpu.memory_space<vmem>>, vector<1x192xf32>
      %21 = vector.broadcast %20 : vector<1x192xf32> to vector<8x192xf32>
      %22 = arith.addf %19, %21 : vector<8x192xf32>
      %c0_15 = arith.constant 0 : index
      %c0_16 = arith.constant 0 : index
      %23 = vector.load %arg6[%c0_15, %c0_16] : memref<8x192xf32, #tpu.memory_space<vmem>>, vector<8x192xf32>
      tpu.vector_store %arg6[%c0_15, %c0_16], %22 {strides = array<i32>} : memref<8x192xf32, #tpu.memory_space<vmem>>, vector<8x192xf32>,
    } else {
    }
    return
  }
  func.func @transform_0(%arg0: i32, %arg1: i32, %arg2: i32) -> (i32, i32) {
    %c0_i32 = arith.constant 0 : i32
    return %arg0, %arg2 : i32, i32
  }
  func.func @transform_1(%arg0: i32, %arg1: i32, %arg2: i32) -> (i32, i32) {
    %c0_i32 = arith.constant 0 : i32
    return %arg2, %arg1 : i32, i32
  }
  func.func @transform_2(%arg0: i32, %arg1: i32, %arg2: i32) -> (i32, i32) {
    %c0_i32 = arith.constant 0 : i32
    %c0_i32_0 = arith.constant 0 : i32
    return %c0_i32, %arg1 : i32, i32
  }
  func.func @transform_3(%arg0: i32, %arg1: i32, %arg2: i32) -> (i32, i32) {
    %c0_i32 = arith.constant 0 : i32
    return %arg0, %arg1 : i32, i32
  }
}

module attributes {stable_mosaic.version = 11 : i64} {
  func.func @_ln_mod_mm_kernel(%arg0: i32, %arg1: i32, %arg2: i32, %arg3: memref<1x4x32xf32, #tpu.memory_space<vmem>>, %arg4: memref<1x1x32xf32, #tpu.memory_space<vmem>>, %arg5: memref<1x1x32xf32, #tpu.memory_space<vmem>>, %arg6: memref<32x96xbf16, #tpu.memory_space<vmem>>, %arg7: memref<1x96xf32, #tpu.memory_space<vmem>>, %arg8: memref<1x4x96xf32, #tpu.memory_space<vmem>>) attributes {dimension_semantics = [#tpu.dimension_semantics<parallel>, #tpu.dimension_semantics<parallel>, #tpu.dimension_semantics<parallel>], iteration_bounds = array<i64: 8, 1, 1>, scalar_prefetch = 0 : i64, scratch_operands = 0 : i64, tpu.core_type = #tpu.core_type<tc>, window_params = [{transform_indices = @transform_0, window_bounds = array<i64: 1, 4, 32>}, {transform_indices = @transform_1, window_bounds = array<i64: 1, 1, 32>}, {transform_indices = @transform_2, window_bounds = array<i64: 1, 1, 32>}, {transform_indices = @transform_3, window_bounds = array<i64: 32, 96>}, {transform_indices = @transform_4, window_bounds = array<i64: 1, 96>}, {transform_indices = @transform_5, window_bounds = array<i64: 1, 4, 96>}]} {
    %c0 = arith.constant 0 : index
    %c0_0 = arith.constant 0 : index
    %c0_1 = arith.constant 0 : index
    %0 = vector.load %arg3[%c0, %c0_0, %c0_1] : memref<1x4x32xf32, #tpu.memory_space<vmem>>, vector<1x4x32xf32>
    %1 = vector.shape_cast %0 : vector<1x4x32xf32> to vector<4x32xf32>
    %cst = arith.constant dense<0.000000e+00> : vector<4xf32>
    %2 = vector.multi_reduction <add>, %1, %cst [1] : vector<4x32xf32> to vector<4xf32>
    %3 = vector.shape_cast %2 : vector<4xf32> to vector<4x1xf32>
    %cst_2 = arith.constant 3.200000e+01 : f32
    %4 = vector.broadcast %cst_2 : f32 to vector<4x1xf32>
    %5 = arith.divf %3, %4 : vector<4x1xf32>
    %6 = vector.broadcast %5 : vector<4x1xf32> to vector<4x32xf32>
    %7 = arith.subf %1, %6 : vector<4x32xf32>
    %8 = arith.mulf %7, %7 : vector<4x32xf32>
    %cst_3 = arith.constant dense<0.000000e+00> : vector<4xf32>
    %9 = vector.multi_reduction <add>, %8, %cst_3 [1] : vector<4x32xf32> to vector<4xf32>
    %10 = vector.shape_cast %9 : vector<4xf32> to vector<4x1xf32>
    %cst_4 = arith.constant 3.200000e+01 : f32
    %11 = vector.broadcast %cst_4 : f32 to vector<4x1xf32>
    %12 = arith.divf %10, %11 : vector<4x1xf32>
    %13 = vector.broadcast %5 : vector<4x1xf32> to vector<4x32xf32>
    %14 = arith.subf %1, %13 : vector<4x32xf32>
    %cst_5 = arith.constant 9.99999997E-7 : f32
    %15 = vector.broadcast %cst_5 : f32 to vector<4x1xf32>
    %16 = arith.addf %12, %15 : vector<4x1xf32>
    %17 = math.rsqrt %16 : vector<4x1xf32>
    %18 = vector.broadcast %17 : vector<4x1xf32> to vector<4x32xf32>
    %19 = arith.mulf %14, %18 : vector<4x32xf32>
    %c0_6 = arith.constant 0 : index
    %c0_7 = arith.constant 0 : index
    %c0_8 = arith.constant 0 : index
    %20 = vector.load %arg4[%c0_6, %c0_7, %c0_8] : memref<1x1x32xf32, #tpu.memory_space<vmem>>, vector<1x1x32xf32>
    %21 = vector.shape_cast %20 : vector<1x1x32xf32> to vector<1x32xf32>
    %c0_9 = arith.constant 0 : index
    %c0_10 = arith.constant 0 : index
    %c0_11 = arith.constant 0 : index
    %22 = vector.load %arg5[%c0_9, %c0_10, %c0_11] : memref<1x1x32xf32, #tpu.memory_space<vmem>>, vector<1x1x32xf32>
    %23 = vector.shape_cast %22 : vector<1x1x32xf32> to vector<1x32xf32>
    %cst_12 = arith.constant 1.000000e+00 : f32
    %24 = vector.broadcast %cst_12 : f32 to vector<1x32xf32>
    %25 = arith.addf %24, %21 : vector<1x32xf32>
    %26 = vector.broadcast %25 : vector<1x32xf32> to vector<4x32xf32>
    %27 = arith.mulf %19, %26 : vector<4x32xf32>
    %28 = vector.broadcast %23 : vector<1x32xf32> to vector<4x32xf32>
    %29 = arith.addf %27, %28 : vector<4x32xf32>
    %30 = arith.truncf %29 : vector<4x32xf32> to vector<4x32xbf16>
    %c0_13 = arith.constant 0 : index
    %c0_14 = arith.constant 0 : index
    %31 = vector.load %arg6[%c0_13, %c0_14] : memref<32x96xbf16, #tpu.memory_space<vmem>>, vector<32x96xbf16>
    %cst_15 = arith.constant dense<0.000000e+00> : vector<4x96xf32>
    %32 = tpu.matmul %30, %31, %cst_15 {dimension_numbers = #tpu.dot_dimension_numbers<[1], [0], [0], [1], [0, 0, 1, 1], [], []>} : vector<4x32xbf16>, vector<32x96xbf16>, vector<4x96xf32> -> vector<4x96xf32>
    %c0_16 = arith.constant 0 : index
    %c0_17 = arith.constant 0 : index
    %33 = vector.load %arg7[%c0_16, %c0_17] : memref<1x96xf32, #tpu.memory_space<vmem>>, vector<1x96xf32>
    %34 = vector.broadcast %33 : vector<1x96xf32> to vector<4x96xf32>
    %35 = arith.addf %32, %34 : vector<4x96xf32>
    %c0_18 = arith.constant 0 : index
    %c0_19 = arith.constant 0 : index
    %c0_20 = arith.constant 0 : index
    %36 = vector.load %arg8[%c0_18, %c0_19, %c0_20] : memref<1x4x96xf32, #tpu.memory_space<vmem>>, vector<1x4x96xf32>
    %37 = vector.shape_cast %36 : vector<1x4x96xf32> to vector<4x96xf32>
    %38 = vector.shape_cast %35 : vector<4x96xf32> to vector<1x4x96xf32>
    tpu.vector_store %arg8[%c0_18, %c0_19, %c0_20], %38 {strides = array<i32>} : memref<1x4x96xf32, #tpu.memory_space<vmem>>, vector<1x4x96xf32>,
    return
  }
  func.func @transform_0(%arg0: i32, %arg1: i32, %arg2: i32) -> (i32, i32, i32) {
    %c0_i32 = arith.constant 0 : i32
    %c0_i32_0 = arith.constant 0 : i32
    return %arg0, %arg1, %c0_i32 : i32, i32, i32
  }
  func.func @transform_1(%arg0: i32, %arg1: i32, %arg2: i32) -> (i32, i32, i32) {
    %c0_i32 = arith.constant 0 : i32
    %c0_i32_0 = arith.constant 0 : i32
    %c0_i32_1 = arith.constant 0 : i32
    return %arg0, %c0_i32, %c0_i32_0 : i32, i32, i32
  }
  func.func @transform_2(%arg0: i32, %arg1: i32, %arg2: i32) -> (i32, i32, i32) {
    %c0_i32 = arith.constant 0 : i32
    %c0_i32_0 = arith.constant 0 : i32
    %c0_i32_1 = arith.constant 0 : i32
    return %arg0, %c0_i32, %c0_i32_0 : i32, i32, i32
  }
  func.func @transform_3(%arg0: i32, %arg1: i32, %arg2: i32) -> (i32, i32) {
    %c0_i32 = arith.constant 0 : i32
    %c0_i32_0 = arith.constant 0 : i32
    return %c0_i32, %arg2 : i32, i32
  }
  func.func @transform_4(%arg0: i32, %arg1: i32, %arg2: i32) -> (i32, i32) {
    %c0_i32 = arith.constant 0 : i32
    %c0_i32_0 = arith.constant 0 : i32
    return %c0_i32, %arg2 : i32, i32
  }
  func.func @transform_5(%arg0: i32, %arg1: i32, %arg2: i32) -> (i32, i32, i32) {
    %c0_i32 = arith.constant 0 : i32
    return %arg0, %arg1, %arg2 : i32, i32, i32
  }
}

module attributes {stable_mosaic.version = 11 : i64} {
  func.func @_attn_kernel(%arg0: i32, %arg1: memref<1x4x96xf32, #tpu.memory_space<vmem>>, %arg2: memref<1x4x32xf32, #tpu.memory_space<vmem>>) attributes {dimension_semantics = [#tpu.dimension_semantics<parallel>], iteration_bounds = array<i64: 8>, scalar_prefetch = 0 : i64, scratch_operands = 0 : i64, tpu.core_type = #tpu.core_type<tc>, window_params = [{transform_indices = @transform_0, window_bounds = array<i64: 1, 4, 96>}, {transform_indices = @transform_1, window_bounds = array<i64: 1, 4, 32>}]} {
    %c0 = arith.constant 0 : index
    %c0_0 = arith.constant 0 : index
    %c0_1 = arith.constant 0 : index
    %0 = vector.load %arg1[%c0, %c0_0, %c0_1] : memref<1x4x96xf32, #tpu.memory_space<vmem>>, vector<1x4x96xf32>
    %1 = vector.shape_cast %0 : vector<1x4x96xf32> to vector<4x96xf32>
    %2 = vector.extract_strided_slice %1 {offsets = [0, 0], sizes = [4, 16], strides = [1, 1]} : vector<4x96xf32> to vector<4x16xf32>
    %3 = arith.truncf %2 : vector<4x16xf32> to vector<4x16xbf16>
    %4 = vector.extract_strided_slice %1 {offsets = [0, 32], sizes = [4, 16], strides = [1, 1]} : vector<4x96xf32> to vector<4x16xf32>
    %5 = arith.truncf %4 : vector<4x16xf32> to vector<4x16xbf16>
    %6 = vector.extract_strided_slice %1 {offsets = [0, 64], sizes = [4, 16], strides = [1, 1]} : vector<4x96xf32> to vector<4x16xf32>
    %7 = arith.truncf %6 : vector<4x16xf32> to vector<4x16xbf16>
    %cst = arith.constant dense<0.000000e+00> : vector<4x4xf32>
    %8 = tpu.matmul %3, %5, %cst {dimension_numbers = #tpu.dot_dimension_numbers<[1], [1], [0], [0], [0, 0, 1, 0], [], []>} : vector<4x16xbf16>, vector<4x16xbf16>, vector<4x4xf32> -> vector<4x4xf32>
    %cst_2 = arith.constant 2.500000e-01 : f32
    %9 = vector.broadcast %cst_2 : f32 to vector<4x4xf32>
    %10 = arith.mulf %8, %9 : vector<4x4xf32>
    %cst_3 = arith.constant dense<0xFF800000> : vector<4xf32>
    %11 = vector.multi_reduction <maximumf>, %10, %cst_3 [1] : vector<4x4xf32> to vector<4xf32>
    %12 = vector.shape_cast %11 : vector<4xf32> to vector<4x1xf32>
    %13 = vector.broadcast %12 : vector<4x1xf32> to vector<4x4xf32>
    %14 = arith.subf %10, %13 : vector<4x4xf32>
    %15 = math.exp %14 : vector<4x4xf32>
    %cst_4 = arith.constant dense<0.000000e+00> : vector<4xf32>
    %16 = vector.multi_reduction <add>, %15, %cst_4 [1] : vector<4x4xf32> to vector<4xf32>
    %17 = vector.shape_cast %16 : vector<4xf32> to vector<4x1xf32>
    %18 = tpu.reciprocal %17 {approx = true} : vector<4x1xf32> -> vector<4x1xf32>
    %19 = vector.broadcast %18 : vector<4x1xf32> to vector<4x4xf32>
    %20 = arith.mulf %15, %19 : vector<4x4xf32>
    %21 = arith.truncf %20 : vector<4x4xf32> to vector<4x4xbf16>
    %cst_5 = arith.constant dense<0.000000e+00> : vector<4x16xf32>
    %22 = tpu.matmul %21, %7, %cst_5 {dimension_numbers = #tpu.dot_dimension_numbers<[1], [0], [0], [1], [0, 0, 1, 1], [], []>} : vector<4x4xbf16>, vector<4x16xbf16>, vector<4x16xf32> -> vector<4x16xf32>
    %c0_6 = arith.constant 0 : index
    %c0_7 = arith.constant 0 : index
    %c0_8 = arith.constant 0 : index
    %23 = vector.load %arg2[%c0_6, %c0_7, %c0_8] : memref<1x4x32xf32, #tpu.memory_space<vmem>>, vector<1x4x16xf32>
    %24 = vector.shape_cast %23 : vector<1x4x16xf32> to vector<4x16xf32>
    %25 = vector.shape_cast %22 : vector<4x16xf32> to vector<1x4x16xf32>
    tpu.vector_store %arg2[%c0_6, %c0_7, %c0_8], %25 {strides = array<i32>} : memref<1x4x32xf32, #tpu.memory_space<vmem>>, vector<1x4x16xf32>,
    %26 = vector.extract_strided_slice %1 {offsets = [0, 16], sizes = [4, 16], strides = [1, 1]} : vector<4x96xf32> to vector<4x16xf32>
    %27 = arith.truncf %26 : vector<4x16xf32> to vector<4x16xbf16>
    %28 = vector.extract_strided_slice %1 {offsets = [0, 48], sizes = [4, 16], strides = [1, 1]} : vector<4x96xf32> to vector<4x16xf32>
    %29 = arith.truncf %28 : vector<4x16xf32> to vector<4x16xbf16>
    %30 = vector.extract_strided_slice %1 {offsets = [0, 80], sizes = [4, 16], strides = [1, 1]} : vector<4x96xf32> to vector<4x16xf32>
    %31 = arith.truncf %30 : vector<4x16xf32> to vector<4x16xbf16>
    %cst_9 = arith.constant dense<0.000000e+00> : vector<4x4xf32>
    %32 = tpu.matmul %27, %29, %cst_9 {dimension_numbers = #tpu.dot_dimension_numbers<[1], [1], [0], [0], [0, 0, 1, 0], [], []>} : vector<4x16xbf16>, vector<4x16xbf16>, vector<4x4xf32> -> vector<4x4xf32>
    %cst_10 = arith.constant 2.500000e-01 : f32
    %33 = vector.broadcast %cst_10 : f32 to vector<4x4xf32>
    %34 = arith.mulf %32, %33 : vector<4x4xf32>
    %cst_11 = arith.constant dense<0xFF800000> : vector<4xf32>
    %35 = vector.multi_reduction <maximumf>, %34, %cst_11 [1] : vector<4x4xf32> to vector<4xf32>
    %36 = vector.shape_cast %35 : vector<4xf32> to vector<4x1xf32>
    %37 = vector.broadcast %36 : vector<4x1xf32> to vector<4x4xf32>
    %38 = arith.subf %34, %37 : vector<4x4xf32>
    %39 = math.exp %38 : vector<4x4xf32>
    %cst_12 = arith.constant dense<0.000000e+00> : vector<4xf32>
    %40 = vector.multi_reduction <add>, %39, %cst_12 [1] : vector<4x4xf32> to vector<4xf32>
    %41 = vector.shape_cast %40 : vector<4xf32> to vector<4x1xf32>
    %42 = tpu.reciprocal %41 {approx = true} : vector<4x1xf32> -> vector<4x1xf32>
    %43 = vector.broadcast %42 : vector<4x1xf32> to vector<4x4xf32>
    %44 = arith.mulf %39, %43 : vector<4x4xf32>
    %45 = arith.truncf %44 : vector<4x4xf32> to vector<4x4xbf16>
    %cst_13 = arith.constant dense<0.000000e+00> : vector<4x16xf32>
    %46 = tpu.matmul %45, %31, %cst_13 {dimension_numbers = #tpu.dot_dimension_numbers<[1], [0], [0], [1], [0, 0, 1, 1], [], []>} : vector<4x4xbf16>, vector<4x16xbf16>, vector<4x16xf32> -> vector<4x16xf32>
    %c0_14 = arith.constant 0 : index
    %c0_15 = arith.constant 0 : index
    %c16 = arith.constant 16 : index
    %47 = vector.load %arg2[%c0_14, %c0_15, %c16] : memref<1x4x32xf32, #tpu.memory_space<vmem>>, vector<1x4x16xf32>
    %48 = vector.shape_cast %47 : vector<1x4x16xf32> to vector<4x16xf32>
    %49 = vector.shape_cast %46 : vector<4x16xf32> to vector<1x4x16xf32>
    tpu.vector_store %arg2[%c0_14, %c0_15, %c16], %49 {strides = array<i32>} : memref<1x4x32xf32, #tpu.memory_space<vmem>>, vector<1x4x16xf32>,
    return
  }
  func.func @transform_0(%arg0: i32) -> (i32, i32, i32) {
    %c0_i32 = arith.constant 0 : i32
    %c0_i32_0 = arith.constant 0 : i32
    %c0_i32_1 = arith.constant 0 : i32
    return %arg0, %c0_i32, %c0_i32_0 : i32, i32, i32
  }
  func.func @transform_1(%arg0: i32) -> (i32, i32, i32) {
    %c0_i32 = arith.constant 0 : i32
    %c0_i32_0 = arith.constant 0 : i32
    %c0_i32_1 = arith.constant 0 : i32
    return %arg0, %c0_i32, %c0_i32_0 : i32, i32, i32
  }
}

module attributes {stable_mosaic.version = 11 : i64} {
  func.func @_mm_gate_res_kernel(%arg0: i32, %arg1: i32, %arg2: i32, %arg3: i32, %arg4: memref<1x4x32xf32, #tpu.memory_space<vmem>>, %arg5: memref<32x32xbf16, #tpu.memory_space<vmem>>, %arg6: memref<1x32xf32, #tpu.memory_space<vmem>>, %arg7: memref<1x1x32xf32, #tpu.memory_space<vmem>>, %arg8: memref<1x4x32xf32, #tpu.memory_space<vmem>>, %arg9: memref<1x4x32xf32, #tpu.memory_space<vmem>>, %arg10: memref<4x32xf32, #tpu.memory_space<vmem>>) attributes {dimension_semantics = [#tpu.dimension_semantics<parallel>, #tpu.dimension_semantics<parallel>, #tpu.dimension_semantics<parallel>, #tpu.dimension_semantics<arbitrary>], iteration_bounds = array<i64: 8, 1, 1, 1>, scalar_prefetch = 0 : i64, scratch_operands = 1 : i64, tpu.core_type = #tpu.core_type<tc>, window_params = [{transform_indices = @transform_0, window_bounds = array<i64: 1, 4, 32>}, {transform_indices = @transform_1, window_bounds = array<i64: 32, 32>}, {transform_indices = @transform_2, window_bounds = array<i64: 1, 32>}, {transform_indices = @transform_3, window_bounds = array<i64: 1, 1, 32>}, {transform_indices = @transform_4, window_bounds = array<i64: 1, 4, 32>}, {transform_indices = @transform_5, window_bounds = array<i64: 1, 4, 32>}]} {
    %c0_i32 = arith.constant 0 : i32
    %0 = arith.cmpi eq, %arg3, %c0_i32 : i32
    %1 = arith.extui %0 : i1 to i32
    %c0_i32_0 = arith.constant 0 : i32
    %2 = arith.cmpi ne, %1, %c0_i32_0 : i32
    scf.if %2 {
      %cst_11 = arith.constant 0.000000e+00 : f32
      %14 = vector.broadcast %cst_11 : f32 to vector<4x32xf32>
      %c0_12 = arith.constant 0 : index
      %c0_13 = arith.constant 0 : index
      %15 = vector.load %arg10[%c0_12, %c0_13] : memref<4x32xf32, #tpu.memory_space<vmem>>, vector<4x32xf32>
      tpu.vector_store %arg10[%c0_12, %c0_13], %14 {strides = array<i32>} : memref<4x32xf32, #tpu.memory_space<vmem>>, vector<4x32xf32>,
    } else {
    }
    %c0 = arith.constant 0 : index
    %c0_1 = arith.constant 0 : index
    %3 = vector.load %arg10[%c0, %c0_1] : memref<4x32xf32, #tpu.memory_space<vmem>>, vector<4x32xf32>
    %c0_2 = arith.constant 0 : index
    %c0_3 = arith.constant 0 : index
    %c0_4 = arith.constant 0 : index
    %4 = vector.load %arg4[%c0_2, %c0_3, %c0_4] : memref<1x4x32xf32, #tpu.memory_space<vmem>>, vector<1x4x32xf32>
    %5 = vector.shape_cast %4 : vector<1x4x32xf32> to vector<4x32xf32>
    %6 = arith.truncf %5 : vector<4x32xf32> to vector<4x32xbf16>
    %c0_5 = arith.constant 0 : index
    %c0_6 = arith.constant 0 : index
    %7 = vector.load %arg5[%c0_5, %c0_6] : memref<32x32xbf16, #tpu.memory_space<vmem>>, vector<32x32xbf16>
    %cst = arith.constant dense<0.000000e+00> : vector<4x32xf32>
    %8 = tpu.matmul %6, %7, %cst {dimension_numbers = #tpu.dot_dimension_numbers<[1], [0], [0], [1], [0, 0, 1, 1], [], []>} : vector<4x32xbf16>, vector<32x32xbf16>, vector<4x32xf32> -> vector<4x32xf32>
    %9 = arith.addf %3, %8 : vector<4x32xf32>
    %c0_7 = arith.constant 0 : index
    %c0_8 = arith.constant 0 : index
    %10 = vector.load %arg10[%c0_7, %c0_8] : memref<4x32xf32, #tpu.memory_space<vmem>>, vector<4x32xf32>
    tpu.vector_store %arg10[%c0_7, %c0_8], %9 {strides = array<i32>} : memref<4x32xf32, #tpu.memory_space<vmem>>, vector<4x32xf32>,
    %c0_i32_9 = arith.constant 0 : i32
    %11 = arith.cmpi eq, %arg3, %c0_i32_9 : i32
    %12 = arith.extui %11 : i1 to i32
    %c0_i32_10 = arith.constant 0 : i32
    %13 = arith.cmpi ne, %12, %c0_i32_10 : i32
    scf.if %13 {
      %c0_11 = arith.constant 0 : index
      %c0_12 = arith.constant 0 : index
      %14 = vector.load %arg10[%c0_11, %c0_12] : memref<4x32xf32, #tpu.memory_space<vmem>>, vector<4x32xf32>
      %c0_13 = arith.constant 0 : index
      %c0_14 = arith.constant 0 : index
      %15 = vector.load %arg6[%c0_13, %c0_14] : memref<1x32xf32, #tpu.memory_space<vmem>>, vector<1x32xf32>
      %16 = vector.broadcast %15 : vector<1x32xf32> to vector<4x32xf32>
      %17 = arith.addf %14, %16 : vector<4x32xf32>
      %c0_15 = arith.constant 0 : index
      %c0_16 = arith.constant 0 : index
      %c0_17 = arith.constant 0 : index
      %18 = vector.load %arg7[%c0_15, %c0_16, %c0_17] : memref<1x1x32xf32, #tpu.memory_space<vmem>>, vector<1x1x32xf32>
      %19 = vector.shape_cast %18 : vector<1x1x32xf32> to vector<1x32xf32>
      %c0_18 = arith.constant 0 : index
      %c0_19 = arith.constant 0 : index
      %c0_20 = arith.constant 0 : index
      %20 = vector.load %arg8[%c0_18, %c0_19, %c0_20] : memref<1x4x32xf32, #tpu.memory_space<vmem>>, vector<1x4x32xf32>
      %21 = vector.shape_cast %20 : vector<1x4x32xf32> to vector<4x32xf32>
      %22 = vector.broadcast %19 : vector<1x32xf32> to vector<4x32xf32>
      %23 = arith.mulf %22, %17 : vector<4x32xf32>
      %24 = arith.addf %21, %23 : vector<4x32xf32>
      %c0_21 = arith.constant 0 : index
      %c0_22 = arith.constant 0 : index
      %c0_23 = arith.constant 0 : index
      %25 = vector.load %arg9[%c0_21, %c0_22, %c0_23] : memref<1x4x32xf32, #tpu.memory_space<vmem>>, vector<1x4x32xf32>
      %26 = vector.shape_cast %25 : vector<1x4x32xf32> to vector<4x32xf32>
      %27 = vector.shape_cast %24 : vector<4x32xf32> to vector<1x4x32xf32>
      tpu.vector_store %arg9[%c0_21, %c0_22, %c0_23], %27 {strides = array<i32>} : memref<1x4x32xf32, #tpu.memory_space<vmem>>, vector<1x4x32xf32>,
    } else {
    }
    return
  }
  func.func @transform_0(%arg0: i32, %arg1: i32, %arg2: i32, %arg3: i32) -> (i32, i32, i32) {
    %c0_i32 = arith.constant 0 : i32
    return %arg0, %arg1, %arg3 : i32, i32, i32
  }
  func.func @transform_1(%arg0: i32, %arg1: i32, %arg2: i32, %arg3: i32) -> (i32, i32) {
    %c0_i32 = arith.constant 0 : i32
    return %arg3, %arg2 : i32, i32
  }
  func.func @transform_2(%arg0: i32, %arg1: i32, %arg2: i32, %arg3: i32) -> (i32, i32) {
    %c0_i32 = arith.constant 0 : i32
    %c0_i32_0 = arith.constant 0 : i32
    return %c0_i32, %arg2 : i32, i32
  }
  func.func @transform_3(%arg0: i32, %arg1: i32, %arg2: i32, %arg3: i32) -> (i32, i32, i32) {
    %c0_i32 = arith.constant 0 : i32
    %c0_i32_0 = arith.constant 0 : i32
    return %arg0, %c0_i32, %arg2 : i32, i32, i32
  }
  func.func @transform_4(%arg0: i32, %arg1: i32, %arg2: i32, %arg3: i32) -> (i32, i32, i32) {
    %c0_i32 = arith.constant 0 : i32
    return %arg0, %arg1, %arg2 : i32, i32, i32
  }
  func.func @transform_5(%arg0: i32, %arg1: i32, %arg2: i32, %arg3: i32) -> (i32, i32, i32) {
    %c0_i32 = arith.constant 0 : i32
    return %arg0, %arg1, %arg2 : i32, i32, i32
  }
}

module attributes {stable_mosaic.version = 11 : i64} {
  func.func @_ln_mod_mm_kernel(%arg0: i32, %arg1: i32, %arg2: i32, %arg3: memref<1x4x32xf32, #tpu.memory_space<vmem>>, %arg4: memref<1x1x32xf32, #tpu.memory_space<vmem>>, %arg5: memref<1x1x32xf32, #tpu.memory_space<vmem>>, %arg6: memref<32x128xbf16, #tpu.memory_space<vmem>>, %arg7: memref<1x128xf32, #tpu.memory_space<vmem>>, %arg8: memref<1x4x128xf32, #tpu.memory_space<vmem>>) attributes {dimension_semantics = [#tpu.dimension_semantics<parallel>, #tpu.dimension_semantics<parallel>, #tpu.dimension_semantics<parallel>], iteration_bounds = array<i64: 8, 1, 1>, scalar_prefetch = 0 : i64, scratch_operands = 0 : i64, tpu.core_type = #tpu.core_type<tc>, window_params = [{transform_indices = @transform_0, window_bounds = array<i64: 1, 4, 32>}, {transform_indices = @transform_1, window_bounds = array<i64: 1, 1, 32>}, {transform_indices = @transform_2, window_bounds = array<i64: 1, 1, 32>}, {transform_indices = @transform_3, window_bounds = array<i64: 32, 128>}, {transform_indices = @transform_4, window_bounds = array<i64: 1, 128>}, {transform_indices = @transform_5, window_bounds = array<i64: 1, 4, 128>}]} {
    %c0 = arith.constant 0 : index
    %c0_0 = arith.constant 0 : index
    %c0_1 = arith.constant 0 : index
    %0 = vector.load %arg3[%c0, %c0_0, %c0_1] : memref<1x4x32xf32, #tpu.memory_space<vmem>>, vector<1x4x32xf32>
    %1 = vector.shape_cast %0 : vector<1x4x32xf32> to vector<4x32xf32>
    %cst = arith.constant dense<0.000000e+00> : vector<4xf32>
    %2 = vector.multi_reduction <add>, %1, %cst [1] : vector<4x32xf32> to vector<4xf32>
    %3 = vector.shape_cast %2 : vector<4xf32> to vector<4x1xf32>
    %cst_2 = arith.constant 3.200000e+01 : f32
    %4 = vector.broadcast %cst_2 : f32 to vector<4x1xf32>
    %5 = arith.divf %3, %4 : vector<4x1xf32>
    %6 = vector.broadcast %5 : vector<4x1xf32> to vector<4x32xf32>
    %7 = arith.subf %1, %6 : vector<4x32xf32>
    %8 = arith.mulf %7, %7 : vector<4x32xf32>
    %cst_3 = arith.constant dense<0.000000e+00> : vector<4xf32>
    %9 = vector.multi_reduction <add>, %8, %cst_3 [1] : vector<4x32xf32> to vector<4xf32>
    %10 = vector.shape_cast %9 : vector<4xf32> to vector<4x1xf32>
    %cst_4 = arith.constant 3.200000e+01 : f32
    %11 = vector.broadcast %cst_4 : f32 to vector<4x1xf32>
    %12 = arith.divf %10, %11 : vector<4x1xf32>
    %13 = vector.broadcast %5 : vector<4x1xf32> to vector<4x32xf32>
    %14 = arith.subf %1, %13 : vector<4x32xf32>
    %cst_5 = arith.constant 9.99999997E-7 : f32
    %15 = vector.broadcast %cst_5 : f32 to vector<4x1xf32>
    %16 = arith.addf %12, %15 : vector<4x1xf32>
    %17 = math.rsqrt %16 : vector<4x1xf32>
    %18 = vector.broadcast %17 : vector<4x1xf32> to vector<4x32xf32>
    %19 = arith.mulf %14, %18 : vector<4x32xf32>
    %c0_6 = arith.constant 0 : index
    %c0_7 = arith.constant 0 : index
    %c0_8 = arith.constant 0 : index
    %20 = vector.load %arg4[%c0_6, %c0_7, %c0_8] : memref<1x1x32xf32, #tpu.memory_space<vmem>>, vector<1x1x32xf32>
    %21 = vector.shape_cast %20 : vector<1x1x32xf32> to vector<1x32xf32>
    %c0_9 = arith.constant 0 : index
    %c0_10 = arith.constant 0 : index
    %c0_11 = arith.constant 0 : index
    %22 = vector.load %arg5[%c0_9, %c0_10, %c0_11] : memref<1x1x32xf32, #tpu.memory_space<vmem>>, vector<1x1x32xf32>
    %23 = vector.shape_cast %22 : vector<1x1x32xf32> to vector<1x32xf32>
    %cst_12 = arith.constant 1.000000e+00 : f32
    %24 = vector.broadcast %cst_12 : f32 to vector<1x32xf32>
    %25 = arith.addf %24, %21 : vector<1x32xf32>
    %26 = vector.broadcast %25 : vector<1x32xf32> to vector<4x32xf32>
    %27 = arith.mulf %19, %26 : vector<4x32xf32>
    %28 = vector.broadcast %23 : vector<1x32xf32> to vector<4x32xf32>
    %29 = arith.addf %27, %28 : vector<4x32xf32>
    %30 = arith.truncf %29 : vector<4x32xf32> to vector<4x32xbf16>
    %c0_13 = arith.constant 0 : index
    %c0_14 = arith.constant 0 : index
    %31 = vector.load %arg6[%c0_13, %c0_14] : memref<32x128xbf16, #tpu.memory_space<vmem>>, vector<32x128xbf16>
    %cst_15 = arith.constant dense<0.000000e+00> : vector<4x128xf32>
    %32 = tpu.matmul %30, %31, %cst_15 {dimension_numbers = #tpu.dot_dimension_numbers<[1], [0], [0], [1], [0, 0, 1, 1], [], []>} : vector<4x32xbf16>, vector<32x128xbf16>, vector<4x128xf32> -> vector<4x128xf32>
    %c0_16 = arith.constant 0 : index
    %c0_17 = arith.constant 0 : index
    %33 = vector.load %arg7[%c0_16, %c0_17] : memref<1x128xf32, #tpu.memory_space<vmem>>, vector<1x128xf32>
    %34 = vector.broadcast %33 : vector<1x128xf32> to vector<4x128xf32>
    %35 = arith.addf %32, %34 : vector<4x128xf32>
    %36 = arith.mulf %35, %35 : vector<4x128xf32>
    %37 = arith.mulf %35, %36 : vector<4x128xf32>
    %cst_18 = arith.constant 4.471500e-02 : f32
    %38 = vector.broadcast %cst_18 : f32 to vector<4x128xf32>
    %39 = arith.mulf %38, %37 : vector<4x128xf32>
    %40 = arith.addf %35, %39 : vector<4x128xf32>
    %cst_19 = arith.constant 0.797884583 : f32
    %41 = vector.broadcast %cst_19 : f32 to vector<4x128xf32>
    %42 = arith.mulf %41, %40 : vector<4x128xf32>
    %43 = math.tanh %42 : vector<4x128xf32>
    %cst_20 = arith.constant 1.000000e+00 : f32
    %44 = vector.broadcast %cst_20 : f32 to vector<4x128xf32>
    %45 = arith.addf %44, %43 : vector<4x128xf32>
    %cst_21 = arith.constant 5.000000e-01 : f32
    %46 = vector.broadcast %cst_21 : f32 to vector<4x128xf32>
    %47 = arith.mulf %46, %45 : vector<4x128xf32>
    %48 = arith.mulf %35, %47 : vector<4x128xf32>
    %c0_22 = arith.constant 0 : index
    %c0_23 = arith.constant 0 : index
    %c0_24 = arith.constant 0 : index
    %49 = vector.load %arg8[%c0_22, %c0_23, %c0_24] : memref<1x4x128xf32, #tpu.memory_space<vmem>>, vector<1x4x128xf32>
    %50 = vector.shape_cast %49 : vector<1x4x128xf32> to vector<4x128xf32>
    %51 = vector.shape_cast %48 : vector<4x128xf32> to vector<1x4x128xf32>
    tpu.vector_store %arg8[%c0_22, %c0_23, %c0_24], %51 {strides = array<i32>} : memref<1x4x128xf32, #tpu.memory_space<vmem>>, vector<1x4x128xf32>,
    return
  }
  func.func @transform_0(%arg0: i32, %arg1: i32, %arg2: i32) -> (i32, i32, i32) {
    %c0_i32 = arith.constant 0 : i32
    %c0_i32_0 = arith.constant 0 : i32
    return %arg0, %arg1, %c0_i32 : i32, i32, i32
  }
  func.func @transform_1(%arg0: i32, %arg1: i32, %arg2: i32) -> (i32, i32, i32) {
    %c0_i32 = arith.constant 0 : i32
    %c0_i32_0 = arith.constant 0 : i32
    %c0_i32_1 = arith.constant 0 : i32
    return %arg0, %c0_i32, %c0_i32_0 : i32, i32, i32
  }
  func.func @transform_2(%arg0: i32, %arg1: i32, %arg2: i32) -> (i32, i32, i32) {
    %c0_i32 = arith.constant 0 : i32
    %c0_i32_0 = arith.constant 0 : i32
    %c0_i32_1 = arith.constant 0 : i32
    return %arg0, %c0_i32, %c0_i32_0 : i32, i32, i32
  }
  func.func @transform_3(%arg0: i32, %arg1: i32, %arg2: i32) -> (i32, i32) {
    %c0_i32 = arith.constant 0 : i32
    %c0_i32_0 = arith.constant 0 : i32
    return %c0_i32, %arg2 : i32, i32
  }
  func.func @transform_4(%arg0: i32, %arg1: i32, %arg2: i32) -> (i32, i32) {
    %c0_i32 = arith.constant 0 : i32
    %c0_i32_0 = arith.constant 0 : i32
    return %c0_i32, %arg2 : i32, i32
  }
  func.func @transform_5(%arg0: i32, %arg1: i32, %arg2: i32) -> (i32, i32, i32) {
    %c0_i32 = arith.constant 0 : i32
    return %arg0, %arg1, %arg2 : i32, i32, i32
  }
}

module attributes {stable_mosaic.version = 11 : i64} {
  func.func @_mm_gate_res_kernel(%arg0: i32, %arg1: i32, %arg2: i32, %arg3: i32, %arg4: memref<1x4x128xf32, #tpu.memory_space<vmem>>, %arg5: memref<128x32xbf16, #tpu.memory_space<vmem>>, %arg6: memref<1x32xf32, #tpu.memory_space<vmem>>, %arg7: memref<1x1x32xf32, #tpu.memory_space<vmem>>, %arg8: memref<1x4x32xf32, #tpu.memory_space<vmem>>, %arg9: memref<1x4x32xf32, #tpu.memory_space<vmem>>, %arg10: memref<4x32xf32, #tpu.memory_space<vmem>>) attributes {dimension_semantics = [#tpu.dimension_semantics<parallel>, #tpu.dimension_semantics<parallel>, #tpu.dimension_semantics<parallel>, #tpu.dimension_semantics<arbitrary>], iteration_bounds = array<i64: 8, 1, 1, 1>, scalar_prefetch = 0 : i64, scratch_operands = 1 : i64, tpu.core_type = #tpu.core_type<tc>, window_params = [{transform_indices = @transform_0, window_bounds = array<i64: 1, 4, 128>}, {transform_indices = @transform_1, window_bounds = array<i64: 128, 32>}, {transform_indices = @transform_2, window_bounds = array<i64: 1, 32>}, {transform_indices = @transform_3, window_bounds = array<i64: 1, 1, 32>}, {transform_indices = @transform_4, window_bounds = array<i64: 1, 4, 32>}, {transform_indices = @transform_5, window_bounds = array<i64: 1, 4, 32>}]} {
    %c0_i32 = arith.constant 0 : i32
    %0 = arith.cmpi eq, %arg3, %c0_i32 : i32
    %1 = arith.extui %0 : i1 to i32
    %c0_i32_0 = arith.constant 0 : i32
    %2 = arith.cmpi ne, %1, %c0_i32_0 : i32
    scf.if %2 {
      %cst_11 = arith.constant 0.000000e+00 : f32
      %14 = vector.broadcast %cst_11 : f32 to vector<4x32xf32>
      %c0_12 = arith.constant 0 : index
      %c0_13 = arith.constant 0 : index
      %15 = vector.load %arg10[%c0_12, %c0_13] : memref<4x32xf32, #tpu.memory_space<vmem>>, vector<4x32xf32>
      tpu.vector_store %arg10[%c0_12, %c0_13], %14 {strides = array<i32>} : memref<4x32xf32, #tpu.memory_space<vmem>>, vector<4x32xf32>,
    } else {
    }
    %c0 = arith.constant 0 : index
    %c0_1 = arith.constant 0 : index
    %3 = vector.load %arg10[%c0, %c0_1] : memref<4x32xf32, #tpu.memory_space<vmem>>, vector<4x32xf32>
    %c0_2 = arith.constant 0 : index
    %c0_3 = arith.constant 0 : index
    %c0_4 = arith.constant 0 : index
    %4 = vector.load %arg4[%c0_2, %c0_3, %c0_4] : memref<1x4x128xf32, #tpu.memory_space<vmem>>, vector<1x4x128xf32>
    %5 = vector.shape_cast %4 : vector<1x4x128xf32> to vector<4x128xf32>
    %6 = arith.truncf %5 : vector<4x128xf32> to vector<4x128xbf16>
    %c0_5 = arith.constant 0 : index
    %c0_6 = arith.constant 0 : index
    %7 = vector.load %arg5[%c0_5, %c0_6] : memref<128x32xbf16, #tpu.memory_space<vmem>>, vector<128x32xbf16>
    %cst = arith.constant dense<0.000000e+00> : vector<4x32xf32>
    %8 = tpu.matmul %6, %7, %cst {dimension_numbers = #tpu.dot_dimension_numbers<[1], [0], [0], [1], [0, 0, 1, 1], [], []>} : vector<4x128xbf16>, vector<128x32xbf16>, vector<4x32xf32> -> vector<4x32xf32>
    %9 = arith.addf %3, %8 : vector<4x32xf32>
    %c0_7 = arith.constant 0 : index
    %c0_8 = arith.constant 0 : index
    %10 = vector.load %arg10[%c0_7, %c0_8] : memref<4x32xf32, #tpu.memory_space<vmem>>, vector<4x32xf32>
    tpu.vector_store %arg10[%c0_7, %c0_8], %9 {strides = array<i32>} : memref<4x32xf32, #tpu.memory_space<vmem>>, vector<4x32xf32>,
    %c0_i32_9 = arith.constant 0 : i32
    %11 = arith.cmpi eq, %arg3, %c0_i32_9 : i32
    %12 = arith.extui %11 : i1 to i32
    %c0_i32_10 = arith.constant 0 : i32
    %13 = arith.cmpi ne, %12, %c0_i32_10 : i32
    scf.if %13 {
      %c0_11 = arith.constant 0 : index
      %c0_12 = arith.constant 0 : index
      %14 = vector.load %arg10[%c0_11, %c0_12] : memref<4x32xf32, #tpu.memory_space<vmem>>, vector<4x32xf32>
      %c0_13 = arith.constant 0 : index
      %c0_14 = arith.constant 0 : index
      %15 = vector.load %arg6[%c0_13, %c0_14] : memref<1x32xf32, #tpu.memory_space<vmem>>, vector<1x32xf32>
      %16 = vector.broadcast %15 : vector<1x32xf32> to vector<4x32xf32>
      %17 = arith.addf %14, %16 : vector<4x32xf32>
      %c0_15 = arith.constant 0 : index
      %c0_16 = arith.constant 0 : index
      %c0_17 = arith.constant 0 : index
      %18 = vector.load %arg7[%c0_15, %c0_16, %c0_17] : memref<1x1x32xf32, #tpu.memory_space<vmem>>, vector<1x1x32xf32>
      %19 = vector.shape_cast %18 : vector<1x1x32xf32> to vector<1x32xf32>
      %c0_18 = arith.constant 0 : index
      %c0_19 = arith.constant 0 : index
      %c0_20 = arith.constant 0 : index
      %20 = vector.load %arg8[%c0_18, %c0_19, %c0_20] : memref<1x4x32xf32, #tpu.memory_space<vmem>>, vector<1x4x32xf32>
      %21 = vector.shape_cast %20 : vector<1x4x32xf32> to vector<4x32xf32>
      %22 = vector.broadcast %19 : vector<1x32xf32> to vector<4x32xf32>
      %23 = arith.mulf %22, %17 : vector<4x32xf32>
      %24 = arith.addf %21, %23 : vector<4x32xf32>
      %c0_21 = arith.constant 0 : index
      %c0_22 = arith.constant 0 : index
      %c0_23 = arith.constant 0 : index
      %25 = vector.load %arg9[%c0_21, %c0_22, %c0_23] : memref<1x4x32xf32, #tpu.memory_space<vmem>>, vector<1x4x32xf32>
      %26 = vector.shape_cast %25 : vector<1x4x32xf32> to vector<4x32xf32>
      %27 = vector.shape_cast %24 : vector<4x32xf32> to vector<1x4x32xf32>
      tpu.vector_store %arg9[%c0_21, %c0_22, %c0_23], %27 {strides = array<i32>} : memref<1x4x32xf32, #tpu.memory_space<vmem>>, vector<1x4x32xf32>,
    } else {
    }
    return
  }
  func.func @transform_0(%arg0: i32, %arg1: i32, %arg2: i32, %arg3: i32) -> (i32, i32, i32) {
    %c0_i32 = arith.constant 0 : i32
    return %arg0, %arg1, %arg3 : i32, i32, i32
  }
  func.func @transform_1(%arg0: i32, %arg1: i32, %arg2: i32, %arg3: i32) -> (i32, i32) {
    %c0_i32 = arith.constant 0 : i32
    return %arg3, %arg2 : i32, i32
  }
  func.func @transform_2(%arg0: i32, %arg1: i32, %arg2: i32, %arg3: i32) -> (i32, i32) {
    %c0_i32 = arith.constant 0 : i32
    %c0_i32_0 = arith.constant 0 : i32
    return %c0_i32, %arg2 : i32, i32
  }
  func.func @transform_3(%arg0: i32, %arg1: i32, %arg2: i32, %arg3: i32) -> (i32, i32, i32) {
    %c0_i32 = arith.constant 0 : i32
    %c0_i32_0 = arith.constant 0 : i32
    return %arg0, %c0_i32, %arg2 : i32, i32, i32
  }
  func.func @transform_4(%arg0: i32, %arg1: i32, %arg2: i32, %arg3: i32) -> (i32, i32, i32) {
    %c0_i32 = arith.constant 0 : i32
    return %arg0, %arg1, %arg2 : i32, i32, i32
  }
  func.func @transform_5(%arg0: i32, %arg1: i32, %arg2: i32, %arg3: i32) -> (i32, i32, i32) {
    %c0_i32 = arith.constant 0 : i32
    return %arg0, %arg1, %arg2 : i32, i32, i32
  }
}

module attributes {stable_mosaic.version = 11 : i64} {
  func.func @_dense_kernel(%arg0: i32, %arg1: i32, %arg2: i32, %arg3: memref<8x32xf32, #tpu.memory_space<vmem>>, %arg4: memref<32x64xbf16, #tpu.memory_space<vmem>>, %arg5: memref<1x64xf32, #tpu.memory_space<vmem>>, %arg6: memref<8x64xf32, #tpu.memory_space<vmem>>, %arg7: memref<8x64xf32, #tpu.memory_space<vmem>>) attributes {dimension_semantics = [#tpu.dimension_semantics<parallel>, #tpu.dimension_semantics<parallel>, #tpu.dimension_semantics<arbitrary>], iteration_bounds = array<i64: 1, 1, 1>, scalar_prefetch = 0 : i64, scratch_operands = 1 : i64, tpu.core_type = #tpu.core_type<tc>, window_params = [{transform_indices = @transform_0, window_bounds = array<i64: 8, 32>}, {transform_indices = @transform_1, window_bounds = array<i64: 32, 64>}, {transform_indices = @transform_2, window_bounds = array<i64: 1, 64>}, {transform_indices = @transform_3, window_bounds = array<i64: 8, 64>}]} {
    %c0_i32 = arith.constant 0 : i32
    %0 = arith.cmpi eq, %arg2, %c0_i32 : i32
    %1 = arith.extui %0 : i1 to i32
    %c0_i32_0 = arith.constant 0 : i32
    %2 = arith.cmpi ne, %1, %c0_i32_0 : i32
    scf.if %2 {
      %cst_11 = arith.constant 0.000000e+00 : f32
      %19 = vector.broadcast %cst_11 : f32 to vector<8x64xf32>
      %c0_12 = arith.constant 0 : index
      %c0_13 = arith.constant 0 : index
      %20 = vector.load %arg7[%c0_12, %c0_13] : memref<8x64xf32, #tpu.memory_space<vmem>>, vector<8x64xf32>
      tpu.vector_store %arg7[%c0_12, %c0_13], %19 {strides = array<i32>} : memref<8x64xf32, #tpu.memory_space<vmem>>, vector<8x64xf32>,
    } else {
    }
    %c0 = arith.constant 0 : index
    %c0_1 = arith.constant 0 : index
    %3 = vector.load %arg3[%c0, %c0_1] : memref<8x32xf32, #tpu.memory_space<vmem>>, vector<8x32xf32>
    %4 = arith.negf %3 : vector<8x32xf32>
    %5 = math.exp %4 : vector<8x32xf32>
    %cst = arith.constant 1.000000e+00 : f32
    %6 = vector.broadcast %cst : f32 to vector<8x32xf32>
    %7 = arith.addf %6, %5 : vector<8x32xf32>
    %8 = arith.divf %6, %7 : vector<8x32xf32>
    %9 = arith.mulf %3, %8 : vector<8x32xf32>
    %c0_2 = arith.constant 0 : index
    %c0_3 = arith.constant 0 : index
    %10 = vector.load %arg7[%c0_2, %c0_3] : memref<8x64xf32, #tpu.memory_space<vmem>>, vector<8x64xf32>
    %11 = arith.truncf %9 : vector<8x32xf32> to vector<8x32xbf16>
    %c0_4 = arith.constant 0 : index
    %c0_5 = arith.constant 0 : index
    %12 = vector.load %arg4[%c0_4, %c0_5] : memref<32x64xbf16, #tpu.memory_space<vmem>>, vector<32x64xbf16>
    %cst_6 = arith.constant dense<0.000000e+00> : vector<8x64xf32>
    %13 = tpu.matmul %11, %12, %cst_6 {dimension_numbers = #tpu.dot_dimension_numbers<[1], [0], [0], [1], [0, 0, 1, 1], [], []>} : vector<8x32xbf16>, vector<32x64xbf16>, vector<8x64xf32> -> vector<8x64xf32>
    %14 = arith.addf %10, %13 : vector<8x64xf32>
    %c0_7 = arith.constant 0 : index
    %c0_8 = arith.constant 0 : index
    %15 = vector.load %arg7[%c0_7, %c0_8] : memref<8x64xf32, #tpu.memory_space<vmem>>, vector<8x64xf32>
    tpu.vector_store %arg7[%c0_7, %c0_8], %14 {strides = array<i32>} : memref<8x64xf32, #tpu.memory_space<vmem>>, vector<8x64xf32>,
    %c0_i32_9 = arith.constant 0 : i32
    %16 = arith.cmpi eq, %arg2, %c0_i32_9 : i32
    %17 = arith.extui %16 : i1 to i32
    %c0_i32_10 = arith.constant 0 : i32
    %18 = arith.cmpi ne, %17, %c0_i32_10 : i32
    scf.if %18 {
      %c0_11 = arith.constant 0 : index
      %c0_12 = arith.constant 0 : index
      %19 = vector.load %arg7[%c0_11, %c0_12] : memref<8x64xf32, #tpu.memory_space<vmem>>, vector<8x64xf32>
      %c0_13 = arith.constant 0 : index
      %c0_14 = arith.constant 0 : index
      %20 = vector.load %arg5[%c0_13, %c0_14] : memref<1x64xf32, #tpu.memory_space<vmem>>, vector<1x64xf32>
      %21 = vector.broadcast %20 : vector<1x64xf32> to vector<8x64xf32>
      %22 = arith.addf %19, %21 : vector<8x64xf32>
      %c0_15 = arith.constant 0 : index
      %c0_16 = arith.constant 0 : index
      %23 = vector.load %arg6[%c0_15, %c0_16] : memref<8x64xf32, #tpu.memory_space<vmem>>, vector<8x64xf32>
      tpu.vector_store %arg6[%c0_15, %c0_16], %22 {strides = array<i32>} : memref<8x64xf32, #tpu.memory_space<vmem>>, vector<8x64xf32>,
    } else {
    }
    return
  }
  func.func @transform_0(%arg0: i32, %arg1: i32, %arg2: i32) -> (i32, i32) {
    %c0_i32 = arith.constant 0 : i32
    return %arg0, %arg2 : i32, i32
  }
  func.func @transform_1(%arg0: i32, %arg1: i32, %arg2: i32) -> (i32, i32) {
    %c0_i32 = arith.constant 0 : i32
    return %arg2, %arg1 : i32, i32
  }
  func.func @transform_2(%arg0: i32, %arg1: i32, %arg2: i32) -> (i32, i32) {
    %c0_i32 = arith.constant 0 : i32
    %c0_i32_0 = arith.constant 0 : i32
    return %c0_i32, %arg1 : i32, i32
  }
  func.func @transform_3(%arg0: i32, %arg1: i32, %arg2: i32) -> (i32, i32) {
    %c0_i32 = arith.constant 0 : i32
    return %arg0, %arg1 : i32, i32
  }
}

module attributes {stable_mosaic.version = 11 : i64} {
  func.func @_ln_mod_mm_kernel(%arg0: i32, %arg1: i32, %arg2: i32, %arg3: memref<1x4x32xf32, #tpu.memory_space<vmem>>, %arg4: memref<1x1x32xf32, #tpu.memory_space<vmem>>, %arg5: memref<1x1x32xf32, #tpu.memory_space<vmem>>, %arg6: memref<32x256xbf16, #tpu.memory_space<vmem>>, %arg7: memref<1x256xf32, #tpu.memory_space<vmem>>, %arg8: memref<1x4x256xf32, #tpu.memory_space<vmem>>) attributes {dimension_semantics = [#tpu.dimension_semantics<parallel>, #tpu.dimension_semantics<parallel>, #tpu.dimension_semantics<parallel>], iteration_bounds = array<i64: 8, 1, 1>, scalar_prefetch = 0 : i64, scratch_operands = 0 : i64, tpu.core_type = #tpu.core_type<tc>, window_params = [{transform_indices = @transform_0, window_bounds = array<i64: 1, 4, 32>}, {transform_indices = @transform_1, window_bounds = array<i64: 1, 1, 32>}, {transform_indices = @transform_2, window_bounds = array<i64: 1, 1, 32>}, {transform_indices = @transform_3, window_bounds = array<i64: 32, 256>}, {transform_indices = @transform_4, window_bounds = array<i64: 1, 256>}, {transform_indices = @transform_5, window_bounds = array<i64: 1, 4, 256>}]} {
    %c0 = arith.constant 0 : index
    %c0_0 = arith.constant 0 : index
    %c0_1 = arith.constant 0 : index
    %0 = vector.load %arg3[%c0, %c0_0, %c0_1] : memref<1x4x32xf32, #tpu.memory_space<vmem>>, vector<1x4x32xf32>
    %1 = vector.shape_cast %0 : vector<1x4x32xf32> to vector<4x32xf32>
    %cst = arith.constant dense<0.000000e+00> : vector<4xf32>
    %2 = vector.multi_reduction <add>, %1, %cst [1] : vector<4x32xf32> to vector<4xf32>
    %3 = vector.shape_cast %2 : vector<4xf32> to vector<4x1xf32>
    %cst_2 = arith.constant 3.200000e+01 : f32
    %4 = vector.broadcast %cst_2 : f32 to vector<4x1xf32>
    %5 = arith.divf %3, %4 : vector<4x1xf32>
    %6 = vector.broadcast %5 : vector<4x1xf32> to vector<4x32xf32>
    %7 = arith.subf %1, %6 : vector<4x32xf32>
    %8 = arith.mulf %7, %7 : vector<4x32xf32>
    %cst_3 = arith.constant dense<0.000000e+00> : vector<4xf32>
    %9 = vector.multi_reduction <add>, %8, %cst_3 [1] : vector<4x32xf32> to vector<4xf32>
    %10 = vector.shape_cast %9 : vector<4xf32> to vector<4x1xf32>
    %cst_4 = arith.constant 3.200000e+01 : f32
    %11 = vector.broadcast %cst_4 : f32 to vector<4x1xf32>
    %12 = arith.divf %10, %11 : vector<4x1xf32>
    %13 = vector.broadcast %5 : vector<4x1xf32> to vector<4x32xf32>
    %14 = arith.subf %1, %13 : vector<4x32xf32>
    %cst_5 = arith.constant 9.99999997E-7 : f32
    %15 = vector.broadcast %cst_5 : f32 to vector<4x1xf32>
    %16 = arith.addf %12, %15 : vector<4x1xf32>
    %17 = math.rsqrt %16 : vector<4x1xf32>
    %18 = vector.broadcast %17 : vector<4x1xf32> to vector<4x32xf32>
    %19 = arith.mulf %14, %18 : vector<4x32xf32>
    %c0_6 = arith.constant 0 : index
    %c0_7 = arith.constant 0 : index
    %c0_8 = arith.constant 0 : index
    %20 = vector.load %arg4[%c0_6, %c0_7, %c0_8] : memref<1x1x32xf32, #tpu.memory_space<vmem>>, vector<1x1x32xf32>
    %21 = vector.shape_cast %20 : vector<1x1x32xf32> to vector<1x32xf32>
    %c0_9 = arith.constant 0 : index
    %c0_10 = arith.constant 0 : index
    %c0_11 = arith.constant 0 : index
    %22 = vector.load %arg5[%c0_9, %c0_10, %c0_11] : memref<1x1x32xf32, #tpu.memory_space<vmem>>, vector<1x1x32xf32>
    %23 = vector.shape_cast %22 : vector<1x1x32xf32> to vector<1x32xf32>
    %cst_12 = arith.constant 1.000000e+00 : f32
    %24 = vector.broadcast %cst_12 : f32 to vector<1x32xf32>
    %25 = arith.addf %24, %21 : vector<1x32xf32>
    %26 = vector.broadcast %25 : vector<1x32xf32> to vector<4x32xf32>
    %27 = arith.mulf %19, %26 : vector<4x32xf32>
    %28 = vector.broadcast %23 : vector<1x32xf32> to vector<4x32xf32>
    %29 = arith.addf %27, %28 : vector<4x32xf32>
    %30 = arith.truncf %29 : vector<4x32xf32> to vector<4x32xbf16>
    %c0_13 = arith.constant 0 : index
    %c0_14 = arith.constant 0 : index
    %31 = vector.load %arg6[%c0_13, %c0_14] : memref<32x256xbf16, #tpu.memory_space<vmem>>, vector<32x256xbf16>
    %cst_15 = arith.constant dense<0.000000e+00> : vector<4x256xf32>
    %32 = tpu.matmul %30, %31, %cst_15 {dimension_numbers = #tpu.dot_dimension_numbers<[1], [0], [0], [1], [0, 0, 1, 1], [], []>} : vector<4x32xbf16>, vector<32x256xbf16>, vector<4x256xf32> -> vector<4x256xf32>
    %c0_16 = arith.constant 0 : index
    %c0_17 = arith.constant 0 : index
    %33 = vector.load %arg7[%c0_16, %c0_17] : memref<1x256xf32, #tpu.memory_space<vmem>>, vector<1x256xf32>
    %34 = vector.broadcast %33 : vector<1x256xf32> to vector<4x256xf32>
    %35 = arith.addf %32, %34 : vector<4x256xf32>
    %c0_18 = arith.constant 0 : index
    %c0_19 = arith.constant 0 : index
    %c0_20 = arith.constant 0 : index
    %36 = vector.load %arg8[%c0_18, %c0_19, %c0_20] : memref<1x4x256xf32, #tpu.memory_space<vmem>>, vector<1x4x256xf32>
    %37 = vector.shape_cast %36 : vector<1x4x256xf32> to vector<4x256xf32>
    %38 = vector.shape_cast %35 : vector<4x256xf32> to vector<1x4x256xf32>
    tpu.vector_store %arg8[%c0_18, %c0_19, %c0_20], %38 {strides = array<i32>} : memref<1x4x256xf32, #tpu.memory_space<vmem>>, vector<1x4x256xf32>,
    return
  }
  func.func @transform_0(%arg0: i32, %arg1: i32, %arg2: i32) -> (i32, i32, i32) {
    %c0_i32 = arith.constant 0 : i32
    %c0_i32_0 = arith.constant 0 : i32
    return %arg0, %arg1, %c0_i32 : i32, i32, i32
  }
  func.func @transform_1(%arg0: i32, %arg1: i32, %arg2: i32) -> (i32, i32, i32) {
    %c0_i32 = arith.constant 0 : i32
    %c0_i32_0 = arith.constant 0 : i32
    %c0_i32_1 = arith.constant 0 : i32
    return %arg0, %c0_i32, %c0_i32_0 : i32, i32, i32
  }
  func.func @transform_2(%arg0: i32, %arg1: i32, %arg2: i32) -> (i32, i32, i32) {
    %c0_i32 = arith.constant 0 : i32
    %c0_i32_0 = arith.constant 0 : i32
    %c0_i32_1 = arith.constant 0 : i32
    return %arg0, %c0_i32, %c0_i32_0 : i32, i32, i32
  }
  func.func @transform_3(%arg0: i32, %arg1: i32, %arg2: i32) -> (i32, i32) {
    %c0_i32 = arith.constant 0 : i32
    %c0_i32_0 = arith.constant 0 : i32
    return %c0_i32, %arg2 : i32, i32
  }
  func.func @transform_4(%arg0: i32, %arg1: i32, %arg2: i32) -> (i32, i32) {
    %c0_i32 = arith.constant 0 : i32
    %c0_i32_0 = arith.constant 0 : i32
    return %c0_i32, %arg2 : i32, i32
  }
  func.func @transform_5(%arg0: i32, %arg1: i32, %arg2: i32) -> (i32, i32, i32) {
    %c0_i32 = arith.constant 0 : i32
    return %arg0, %arg1, %arg2 : i32, i32, i32
  }
}

</mosaic_0001>

<bundles_post_ra>
// kernel: dit_video_forward.17
= control target key start
LH: loop header
LB: loop body
LE: loop exit
PB: predicated region body
PF: predicated region fallthrough
CT: control target
= control target key end

     0   :  { %vm18_vm0 = vcmask 261120   ;;  %v335_v28 = vmov 0.0   ;;  %s455_s1 = inlined_call_operand.vmem [shape: bf16[256,32], index: 1, kind: input, shape index: {}]   ;;  %s456_s0 = inlined_call_operand.vmem [shape: f32[32,256], index: 0, kind: input, shape index: {}]   ;;  %s457_s2 = inlined_call_operand.vmem [shape: f32[1,32], index: 2, kind: input, shape index: {}]   ;;  %s458_s3 = inlined_call_operand.vmem [shape: f32[32,32], index: 3, kind: output, shape index: {}]  }
   0x1   :  { %v308_v0 = vld [vmem:[%s455_s1 + $0x38] sm:$0xff]  ;;  %v307_v2 = vld [vmem:[%s455_s1 + $0x30] sm:$0xff]  ;;  %v306_v4 = vld [vmem:[%s455_s1 + $0x28] sm:$0xff]  ;;  %19 = vst.msk [vmem:[#allocation2] sm:$0xff] %vm18_vm0, %v335_v28 }
   0x2   :  { %v316_v1 = vld [vmem:[%s455_s1 + $0x78] sm:$0xff]  ;;  %167 = vmatpush.bf16.msra.mxu0 %v308_v0  ;;  %317 = vmatpush.bf16.msra.mxu2 %v308_v0  ;;  %v315_v3 = vld [vmem:[%s455_s1 + $0x70] sm:$0xff]  ;;  %v314_v5 = vld [vmem:[%s455_s1 + $0x68] sm:$0xff]  ;;  %20 = vst.msk [vmem:[#allocation2 + $0x8] sm:$0xff] %vm18_vm0, %v335_v28 }
   0x3   :  { %186 = vmatpush.bf16.msra.mxu1 %v316_v1  ;;  %325 = vmatpush.bf16.msra.mxu3 %v316_v1  ;;  %v305_v6 = vld [vmem:[%s455_s1 + $0x20] sm:$0xff]  ;;  %v304_v8 = vld [vmem:[%s455_s1 + $0x18] sm:$0xff]  ;;  %v303_v10 = vld [vmem:[%s455_s1 + $0x10] sm:$0xff]  ;;  %21 = vst.msk [vmem:[#allocation2 + $0x10] sm:$0xff] %vm18_vm0, %v335_v28 }
   0x4   :  { %v313_v7 = vld [vmem:[%s455_s1 + $0x60] sm:$0xff]  ;;  %v312_v9 = vld [vmem:[%s455_s1 + $0x58] sm:$0xff]  ;;  %v311_v11 = vld [vmem:[%s455_s1 + $0x50] sm:$0xff]  ;;  %22 = vst.msk [vmem:[#allocation2 + $0x18] sm:$0xff] %vm18_vm0, %v335_v28 }
   0x5   :  { %v302_v12 = vld [vmem:[%s455_s1 + $0x8] sm:$0xff]  ;;  %v301_v14 = vld [vmem:[%s455_s1] sm:$0xff]  ;;  %v25_v17 = vld [vmem:[%s456_s0 + $0x10] sm:$0xff] }
   0x6   :  { %168 = vmatpush.bf16.msra.mxu0 %v307_v2  ;;  %318 = vmatpush.bf16.msra.mxu2 %v307_v2  ;;  %v310_v13 = vld [vmem:[%s455_s1 + $0x48] sm:$0xff]  ;;  %v309_v15 = vld [vmem:[%s455_s1 + $0x40] sm:$0xff]  ;;  %v29_v19 = vld [vmem:[%s456_s0 + $0x30] sm:$0xff] }
   0x7   :  { %187 = vmatpush.bf16.msra.mxu1 %v315_v3  ;;  %326 = vmatpush.bf16.msra.mxu3 %v315_v3  ;;  %v23_v16 = vld [vmem:[%s456_s0] sm:$0xff]  ;;  %v24_v20 = vld [vmem:[%s456_s0 + $0x8] sm:$0xff]  ;;  %v26_v21 = vld [vmem:[%s456_s0 + $0x18] sm:$0xff] }
   0x8   :  { %v27_v18 = vld [vmem:[%s456_s0 + $0x20] sm:$0xff]  ;;  %v28_v22 = vld [vmem:[%s456_s0 + $0x28] sm:$0xff]  ;;  %v30_v23 = vld [vmem:[%s456_s0 + $0x38] sm:$0xff]  ;;  %v35_v24 = vpack.c.bf16 %v25_v17, %v23_v16  ;;  %v36_v26 = vpack.c.bf16 %v26_v21, %v24_v20 }
   0x9   :  { %v37_v25 = vpack.c.bf16 %v29_v19, %v27_v18  ;;  %v38_v27 = vpack.c.bf16 %v30_v23, %v28_v22  ;;  %v31_v30 = vld [vmem:[#allocation2] sm:$0xff]  ;;  %v32_v39 = vld [vmem:[#allocation2 + $0x8] sm:$0xff] }
   0xa   :  { %169 = vmatpush.bf16.msra.mxu0 %v306_v4  ;;  %319 = vmatpush.bf16.msra.mxu2 %v306_v4  ;;  %v33_v35 = vld [vmem:[#allocation2 + $0x10] sm:$0xff]  ;;  %v334_v41 = vld [vmem:[%s457_s2] ss:$0 sm:$0xff] }
   0xb   :  { %188 = vmatpush.bf16.msra.mxu1 %v314_v5  ;;  %327 = vmatpush.bf16.msra.mxu3 %v314_v5  ;;  %v34_v48 = vld [vmem:[#allocation2 + $0x18] sm:$0xff] }
   0xe   :  { %170 = vmatpush.bf16.msra.mxu0 %v305_v6  ;;  %320 = vmatpush.bf16.msra.mxu2 %v305_v6 }
   0xf   :  { %189 = vmatpush.bf16.msra.mxu1 %v313_v7  ;;  %328 = vmatpush.bf16.msra.mxu3 %v313_v7 }
  0x12   :  { %171 = vmatpush.bf16.msra.mxu0 %v304_v8  ;;  %321 = vmatpush.bf16.msra.mxu2 %v304_v8 }
  0x13   :  { %190 = vmatpush.bf16.msra.mxu1 %v312_v9  ;;  %329 = vmatpush.bf16.msra.mxu3 %v312_v9 }
  0x16   :  { %172 = vmatpush.bf16.msra.mxu0 %v303_v10  ;;  %322 = vmatpush.bf16.msra.mxu2 %v303_v10 }
  0x17   :  { %191 = vmatpush.bf16.msra.mxu1 %v311_v11  ;;  %330 = vmatpush.bf16.msra.mxu3 %v311_v11 }
  0x1a   :  { %173 = vmatpush.bf16.msra.mxu0 %v302_v12  ;;  %323 = vmatpush.bf16.msra.mxu2 %v302_v12 }
  0x1b   :  { %192 = vmatpush.bf16.msra.mxu1 %v310_v13  ;;  %331 = vmatpush.bf16.msra.mxu3 %v310_v13 }
  0x1e   :  { %174 = vmatpush.bf16.msra.mxu0 %v301_v14  ;;  %324 = vmatpush.bf16.msra.mxu2 %v301_v14 }
  0x1f   :  { %193 = vmatpush.bf16.msra.mxu1 %v309_v15  ;;  %332 = vmatpush.bf16.msra.mxu3 %v309_v15 }
  0x21   :  { %175 = vmatmul.bf16.vlgmr.msra.gmra.mxu0 %v35_v24  ;;  %180 = vmatmul.bf16.vlgmr.msra.gmra.mxu2 %v37_v25 }
  0x22   :  { %194 = vmatmul.bf16.vlgmr.msra.gmra.mxu1 %v36_v26  ;;  %199 = vmatmul.bf16.vlgmr.msra.gmra.mxu3 %v38_v27 }
  0x9e   :  { %v176_v29 = vpop.f32.mrf.mxu0 }
  0x9f   :  { %v195_v31 = vpop.f32.mrf.mxu1 }
  0xa0   :  { %v196_v32 = vadd.f32 %v195_v31, %v176_v29 }
  0xa2   :  { %v205_v33 = vadd.f32 %v196_v32, %v31_v30 }
  0xa4   :  { %210 = vst.msk [vmem:[#allocation2] sm:$0xff] %vm18_vm0, %v205_v33  ;;  %v181_v34 = vpop.f32.mrf.mxu2 }
  0xa5   :  { %v200_v36 = vpop.f32.mrf.mxu3 }
  0xa6   :  { %v201_v37 = vadd.f32 %v200_v36, %v181_v34  ;;  %v178_v38 = vpop.f32.mrf.mxu0 }
  0xa7   :  { %v197_v40 = vpop.f32.mrf.mxu1 }
  0xa8   :  { %v207_v42 = vadd.f32 %v201_v37, %v33_v35  ;;  %v198_v43 = vadd.f32 %v197_v40, %v178_v38 }
  0xaa   :  { %212 = vst.msk [vmem:[#allocation2 + $0x10] sm:$0xff] %vm18_vm0, %v207_v42  ;;  %v206_v44 = vadd.f32 %v198_v43, %v32_v39 }
  0xab   :  { %v217_v45 = vld [vmem:[#allocation2] sm:$0xff] }
  0xac   :  { %v225_v46 = vadd.f32 %v334_v41, %v217_v45  ;;  %211 = vst.msk [vmem:[#allocation2 + $0x8] sm:$0xff] %vm18_vm0, %v206_v44  ;;  %v183_v47 = vpop.f32.mrf.mxu2 }
  0xad   :  { %v202_v49 = vpop.f32.mrf.mxu3 }
  0xae   :  { %229 = vst.msk [vmem:[%s458_s3] sm:$0xff] %vm18_vm0, %v225_v46  ;;  %v203_v50 = vadd.f32 %v202_v49, %v183_v47 }
  0xb0   :  { %v208_v51 = vadd.f32 %v203_v50, %v34_v48 }
  0xb1   :  { %v219_v52 = vld [vmem:[#allocation2 + $0x10] sm:$0xff] }
  0xb2   :  { %v227_v53 = vadd.f32 %v334_v41, %v219_v52  ;;  %213 = vst.msk [vmem:[#allocation2 + $0x18] sm:$0xff] %vm18_vm0, %v208_v51 }
  0xb3   :  { %v218_v54 = vld [vmem:[#allocation2 + $0x8] sm:$0xff] }
  0xb4   :  { %231 = vst.msk [vmem:[%s458_s3 + $0x10] sm:$0xff] %vm18_vm0, %v227_v53  ;;  %v226_v55 = vadd.f32 %v334_v41, %v218_v54 }
  0xb6   :  { %230 = vst.msk [vmem:[%s458_s3 + $0x8] sm:$0xff] %vm18_vm0, %v226_v55 }
  0xb9   :  { %v220_v56 = vld [vmem:[#allocation2 + $0x18] sm:$0xff] }
  0xba   :  { %v228_v57 = vadd.f32 %v334_v41, %v220_v56 }
  0xbc   :  { %232 = vst.msk [vmem:[%s458_s3 + $0x18] sm:$0xff] %vm18_vm0, %v228_v57 }

// kernel: dit_video_forward.18
= control target key start
LH: loop header
LB: loop body
LE: loop exit
PB: predicated region body
PF: predicated region fallthrough
CT: control target
= control target key end

     0   :  { %vm19_vm0 = vcmask 254976   ;;  %v112_v1 = vmov 0.0   ;;  %vm40_vm1 = vcmask 261120   ;;  %s151_s1 = inlined_call_operand.vmem [shape: bf16[32,32], index: 1, kind: input, shape index: {}]   ;;  %s152_s0 = inlined_call_operand.vmem [shape: f32[2,32], index: 0, kind: input, shape index: {}]   ;;  %s153_s2 = inlined_call_operand.vmem [shape: f32[1,32], index: 2, kind: input, shape index: {}]   ;;  %s154_s3 = inlined_call_operand.vmem [shape: f32[2,32], index: 3, kind: output, shape index: {}]  }
   0x1   :  { %v105_v0 = vld [vmem:[%s151_s1 + $0x8] sm:$0xff]  ;;  %20 = vst.msk [vmem:[#allocation2] sm:$0x3] %vm19_vm0, %v112_v1  ;;  %v104_v2 = vld [vmem:[%s151_s1] sm:$0xff] }
   0x2   :  { %50 = vmatpush.bf16.msra.mxu0 %v105_v0  ;;  %v21_v3 = vld [vmem:[%s152_s0] sm:$0x3] }
   0x3   :  { %v23_v4 = vpack.c.bf16 %v21_v3, %v21_v3  ;;  %v107_v8 = vld [vmem:[%s153_s2] ss:$0 sm:$0xff] }
   0x6   :  { %51 = vmatpush.bf16.msra.mxu0 %v104_v2 }
   0x8   :  { %v22_v5 = vld [vmem:[#allocation2] sm:$0x3] }
   0x9   :  { %102 = vmatmul.msk.bf16.vlgmr.msra.gmra.mxu0 %vm40_vm1, %v23_v4 }
  0x86   :  { %v53_v6 = vpop.f32.mrf.mxu0 }
  0x87   :  { %v57_v7 = vadd.f32 %v53_v6, %v22_v5 }
  0x89   :  { %59 = vst.msk [vmem:[#allocation2] sm:$0x3] %vm19_vm0, %v57_v7 }
  0x8e   :  { %v55_v9 = vpop.f32.mrf.mxu0 }
  0x90   :  { %v63_v10 = vld [vmem:[#allocation2] sm:$0x3] }
  0x91   :  { %v68_v11 = vadd.f32 %v107_v8, %v63_v10 }
  0x93   :  { %v103_v12 = vmul.f32 -1.442695, %v68_v11 }
  0x95   :  { %108 = vpow2.f32 %v103_v12 }
  0x9b   :  { %v109_v13 = vpop.eup %108 }
  0x9c   :  { %v72_v14 = vadd.f32 1.0, %v109_v13 }
  0x9e   :  { %110 = vrcp.f32 %v72_v14  ;;  %v84_v18 = vand.u32 2147483648, %v72_v14  ;;  %v82_v20 = vand.u32 2147483647, %v72_v14  ;;  %vm78_vm3 = vweird.f32 %v72_v14 }
  0xa0   :  { %v85_v22 = vor.u32 1.1754944e-38, %v84_v18  ;;  %vm83_vm5 = vcmp.eq.f32.partialorder %v82_v20, 8.507059e+37 }
  0xa4   :  { %v111_v15 = vpop.eup %110 }
  0xa5   :  { %v74_v16 = vmul.f32 %v111_v15, %v72_v14  ;;  %vm79_vm2 = vweird.f32 %v111_v15 }
  0xa6   :  { %vm80_vm4 = vmor %vm78_vm3, %vm79_vm2 }
  0xa7   :  { %v75_v17 = vsub.f32 1.0, %v74_v16 }
  0xa9   :  { %v76_v19 = vmul.f32 %v111_v15, %v75_v17 }
  0xab   :  { %v77_v21 = vadd.f32 %v111_v15, %v76_v19 }
  0xad   :  { %v81_v23 = vsel %vm80_vm4, %v111_v15, %v77_v21 }
  0xae   :  { %v86_v24 = vsel %vm83_vm5, %v85_v22, %v81_v23 }
  0xaf   :  { %v88_v25 = vmul.f32 %v86_v24, %v68_v11 }
  0xb1   :  { %89 = vst.msk [vmem:[%s154_s3] sm:$0x3] %vm19_vm0, %v88_v25 }

// kernel: dit_video_forward.19
= control target key start
LH: loop header
LB: loop body
LE: loop exit
PB: predicated region body
PF: predicated region fallthrough
CT: control target
= control target key end

     0   :  { %vm19_vm0 = vcmask 254976   ;;  %v87_v1 = vmov 0.0   ;;  %vm40_vm1 = vcmask 261120   ;;  %s126_s1 = inlined_call_operand.vmem [shape: bf16[32,32], index: 1, kind: input, shape index: {}]   ;;  %s127_s0 = inlined_call_operand.vmem [shape: f32[2,32], index: 0, kind: input, shape index: {}]   ;;  %s128_s2 = inlined_call_operand.vmem [shape: f32[1,32], index: 2, kind: input, shape index: {}]   ;;  %s129_s3 = inlined_call_operand.vmem [shape: f32[2,32], index: 3, kind: output, shape index: {}]  }
   0x1   :  { %v84_v0 = vld [vmem:[%s126_s1 + $0x8] sm:$0xff]  ;;  %20 = vst.msk [vmem:[#allocation2] sm:$0x3] %vm19_vm0, %v87_v1  ;;  %v83_v2 = vld [vmem:[%s126_s1] sm:$0xff] }
   0x2   :  { %50 = vmatpush.bf16.msra.mxu0 %v84_v0  ;;  %v21_v3 = vld [vmem:[%s127_s0] sm:$0x3] }
   0x3   :  { %v23_v4 = vpack.c.bf16 %v21_v3, %v21_v3  ;;  %v86_v8 = vld [vmem:[%s128_s2] ss:$0 sm:$0xff] }
   0x6   :  { %51 = vmatpush.bf16.msra.mxu0 %v83_v2 }
   0x8   :  { %v22_v5 = vld [vmem:[#allocation2] sm:$0x3] }
   0x9   :  { %82 = vmatmul.msk.bf16.vlgmr.msra.gmra.mxu0 %vm40_vm1, %v23_v4 }
  0x86   :  { %v53_v6 = vpop.f32.mrf.mxu0 }
  0x87   :  { %v57_v7 = vadd.f32 %v53_v6, %v22_v5 }
  0x89   :  { %59 = vst.msk [vmem:[#allocation2] sm:$0x3] %vm19_vm0, %v57_v7 }
  0x8e   :  { %v55_v9 = vpop.f32.mrf.mxu0 }
  0x90   :  { %v63_v10 = vld [vmem:[#allocation2] sm:$0x3] }
  0x91   :  { %v68_v11 = vadd.f32 %v86_v8, %v63_v10 }
  0x93   :  { %69 = vst.msk [vmem:[%s129_s3] sm:$0x3] %vm19_vm0, %v68_v11 }

// kernel: dit_video_forward.20
= control target key start
LH: loop header
LB: loop body
LE: loop exit
PB: predicated region body
PF: predicated region fallthrough
CT: control target
= control target key end

     0   :  { %vm20_vm0 = vcmask 523264   ;;  %v152_v14 = vmov 0.0   ;;  %vm70_vm5 = vcmask 261120   ;;  %s212_s1 = inlined_call_operand.vmem [shape: bf16[32,192], index: 1, kind: input, shape index: {}]   ;;  %s213_s0 = inlined_call_operand.vmem [shape: f32[8,32], index: 0, kind: input, shape index: {}]   ;;  %s214_s2 = inlined_call_operand.vmem [shape: f32[1,192], index: 2, kind: input, shape index: {}]   ;;  %s215_s3 = inlined_call_operand.vmem [shape: f32[8,192], index: 3, kind: output, shape index: {}]  }
   0x1   :  { %v135_v0 = vld [vmem:[%s212_s1 + $0x10] sm:$0xf]  ;;  %v146_v1 = vld [vmem:[%s212_s1 + $0x14] sm:$0xf0]  ;;  %v145_v2 = vld [vmem:[%s212_s1 + $0x14] sm:$0xf] }
   0x2   :  { %v136_v3 = vor.u32 %v146_v1, %v135_v0  ;;  %v137_v4 = vld [vmem:[%s212_s1 + $0x18] sm:$0xf0]  ;;  %v127_v5 = vld [vmem:[%s212_s1] sm:$0xf]  ;;  %v144_v6 = vld [vmem:[%s212_s1 + $0x4] sm:$0xf0] }
   0x3   :  { %v140_v7 = vor.u32 %v145_v2, %v137_v4  ;;  %v143_v8 = vld [vmem:[%s212_s1 + $0x4] sm:$0xf]  ;;  %v129_v9 = vld [vmem:[%s212_s1 + $0x8] sm:$0xf0]  ;;  %v128_v11 = vor.u32 %v144_v6, %v127_v5  ;;  %21 = vst.msk [vmem:[#allocation2 + $0x8] sm:$0xff] %vm20_vm0, %v152_v14 }
   0x4   :  { %v22_v10 = vld [vmem:[%s213_s0] sm:$0xff]  ;;  %80 = vmatpush.bf16.msra.mxu0 %v136_v3  ;;  %v132_v13 = vor.u32 %v143_v8, %v129_v9 }
   0x5   :  { %v124_v12 = vmul.f32 -1.442695, %v22_v10  ;;  %93 = vmatpush.bf16.msra.mxu1 %v140_v7  ;;  %v110_v29 = vld [vmem:[%s214_s2] sm:$0x3] }
   0x6   :  { %v112_v31 = vperm.slane %v110_v29, 0  ;;  %v113_v36 = vperm.slane %v110_v29, 1 }
   0x7   :  { %148 = vpow2.f32 %v124_v12 }
   0x8   :  { %81 = vmatpush.bf16.msra.mxu0 %v128_v11 }
   0x9   :  { %94 = vmatpush.bf16.msra.mxu1 %v132_v13 }
   0xa   :  { %v44_v30 = vld [vmem:[#allocation2 + $0x8] sm:$0xff] }
   0xd   :  { %v149_v15 = vpop.eup %148 }
   0xe   :  { %v26_v16 = vadd.f32 1.0, %v149_v15 }
  0x10   :  { %150 = vrcp.f32 %v26_v16  ;;  %v38_v19 = vand.u32 2147483648, %v26_v16  ;;  %vm32_vm1 = vweird.f32 %v26_v16  ;;  %v36_v21 = vand.u32 2147483647, %v26_v16 }
  0x12   :  { %v39_v23 = vor.u32 1.1754944e-38, %v38_v19  ;;  %vm37_vm4 = vcmp.eq.f32.partialorder %v36_v21, 8.507059e+37 }
  0x16   :  { %v151_v17 = vpop.eup %150 }
  0x17   :  { %v28_v18 = vmul.f32 %v151_v17, %v26_v16  ;;  %vm33_vm2 = vweird.f32 %v151_v17 }
  0x18   :  { %vm34_vm3 = vmor %vm32_vm1, %vm33_vm2 }
  0x19   :  { %v29_v20 = vsub.f32 1.0, %v28_v18 }
  0x1b   :  { %v30_v22 = vmul.f32 %v151_v17, %v29_v20 }
  0x1d   :  { %v31_v24 = vadd.f32 %v151_v17, %v30_v22 }
  0x1f   :  { %v35_v25 = vsel %vm34_vm3, %v151_v17, %v31_v24 }
  0x20   :  { %v40_v26 = vsel %vm37_vm4, %v39_v23, %v35_v25 }
  0x21   :  { %v42_v27 = vmul.f32 %v40_v26, %v22_v10 }
  0x23   :  { %v45_v28 = vpack.c.bf16 %v42_v27, %v42_v27 }
  0x25   :  { %141 = vmatmul.msk.bf16.vlgmr.msra.gmra.mxu0 %vm70_vm5, %v45_v28  ;;  %142 = vmatmul.msk.bf16.vlgmr.msra.gmra.mxu1 %vm70_vm5, %v45_v28 }
  0xa2   :  { %v83_v32 = vpop.f32.mrf.mxu0  ;;  %v96_v33 = vpop.f32.mrf.mxu1 }
  0xa3   :  { %v101_v34 = vadd.f32 %v96_v33, %v44_v30  ;;  %v116_v35 = vadd.f32 %v112_v31, %v83_v32 }
  0xa5   :  { %104 = vst.msk [vmem:[#allocation2 + $0x8] sm:$0xff] %vm20_vm0, %v101_v34 }
  0xa6   :  { %118 = vst [vmem:[%s215_s3] sm:$0xff] %v116_v35 }
  0xaa   :  { %v85_v37 = vpop.f32.mrf.mxu0  ;;  %v98_v38 = vpop.f32.mrf.mxu1 }
  0xac   :  { %v109_v39 = vld [vmem:[#allocation2 + $0x8] sm:$0xff] }
  0xad   :  { %v117_v40 = vadd.f32 %v113_v36, %v109_v39 }
  0xaf   :  { %119 = vst.msk [vmem:[%s215_s3 + $0x8] sm:$0xff] %vm20_vm0, %v117_v40 }

// kernel: dit_video_forward.21
= control target key start
LH: loop header
LB: loop body
LE: loop exit
PB: predicated region body
PF: predicated region fallthrough
CT: control target
= control target key end

     0   :  { %s649_s18 = smov 0   ;;  %s651_s19 = smov 0   ;;  %s708_s0 = inlined_call_operand.vmem [shape: f32[8,4,32], index: 0, kind: input, shape index: {}]   ;;  %s709_s1 = inlined_call_operand.vmem [shape: f32[8,1,32], index: 1, kind: input, shape index: {}]   ;;  %s710_s2 = inlined_call_operand.vmem [shape: f32[8,1,32], index: 2, kind: input, shape index: {}]   ;;  %s711_s3 = inlined_call_operand.vmem [shape: bf16[32,96], index: 3, kind: input, shape index: {}]   ;;  %s712_s4 = inlined_call_operand.vmem [shape: f32[1,96], index: 4, kind: input, shape index: {}]   ;;  %s713_s5 = inlined_call_operand.vmem [shape: f32[8,4,96], index: 5, kind: output, shape index: {}]  }
   0x1   :  { %s653_s20 = smov 0  }
   0x2 LB: > { %s34_s21 = sadd.s32 1, %s612_s19  ;;  %p547_p0 = scmp.ge.s32.totalorder %s616_s20, 1  ;;  %s616_s20 = sphi %s653_s20, %s15_s20   ;;  %s612_s19 = sphi %s651_s19, %s715_s19   ;;  %s608_s18 = sphi %s649_s18, %s714_s18  }
   0x3   : > { %p36_p1 = scmp.ge.s32.totalorder %s34_s21, 8  ;;  %p247_p2 = scmp.lt.s32.totalorder %s616_s20, 9 }
   0x5   : > { %s717_s21 = smov (%p36_p1, %s34_s21), 0  ;;  %p248_p3 = pnand %p547_p0, %p247_p2 }
   0x6   : > { %p295_p4 = scmp.lt.s32.totalorder (!%p248_p3), %s608_s18, 7 }
   0x7   : > { %251 = sbr.rel (%p248_p3) target bundleno = 420 (0x1a4), region = 40 }
   0xc   : > { %s719_s18 = smov (!%p295_p4, %s608_s18), 7  ;;  %vm327_vm0 = vcmask 257024   ;;  %v618_v2 = vmov 32.0   ;;  %v562_v14 = vld [vmem:[%s711_s3 + $0x8] sm:$0xff]  ;;  %v561_v15 = vld [vmem:[%s711_s3] sm:$0xff]  ;;  %vm389_vm5 = vcmask 261120  }
   0xd   : > { %s548_s22 = sshll.u32 %s719_s18, 2  ;;  %590 = vrcp.f32 %v618_v2  ;;  %s307_s28 = scalar_lea.vmem %s710_s2, %s719_s18  ;;  %399 = vmatpush.bf16.msra.mxu0 %v562_v14  ;;  %v589_v34 = vld [vmem:[%s712_s4] ss:$0 sm:$0xff]  ;;  %vm406_vm6 = vcmask 781312  }
   0xe   : > { %s301_s25 = scalar_lea.vmem %s708_s0, %s548_s22  ;;  %s304_s10 = scalar_lea.vmem %s709_s1, %s719_s18  ;;  %v588_v30 = vld [vmem:[%s307_s28] ss:$0 sm:$0xff] }
   0xf   : > { %v326_v0 = vld [vmem:[%s301_s25] sm:$0xf]  ;;  %s324_s15 = scalar_lea.vmem %s713_s5, %s548_s22 }
  0x10   : > { %v328_v1 = vsel %vm327_vm0, %v326_v0, 0.0  ;;  %v357_v22 = vld [vmem:[%s304_s10] sm:$0x1] }
  0x11   : > { %329 = vadd.xlane.f32.xlu0 %v328_v1  ;;  %400 = vmatpush.bf16.msra.mxu0 %v561_v15  ;;  %v359_v24 = vadd.f32 1.0, %v357_v22 }
  0x13   : > { %v591_v3 = vpop.eup %590  ;;  %v361_v27 = vperm.slane %v359_v24, 0 }
  0x14   : > { %v332_v4 = vmul.f32 32.0, %v591_v3  ;;  %vm336_vm1 = vweird.f32 %v591_v3 }
  0x16   : > { %v333_v5 = vsub.f32 1.0, %v332_v4 }
  0x18   : > { %v334_v6 = vmul.f32 %v591_v3, %v333_v5 }
  0x1a   : > { %v335_v7 = vadd.f32 %v591_v3, %v334_v6 }
  0x1c   : > { %v337_v8 = vsel %vm336_vm1, %v591_v3, %v335_v7 }
  0x84   : > { %v330_v9 = vpop.xlane.xlu0 %329 }
  0x85   : > { %v338_v10 = vmul.f32 %v337_v8, %v330_v9 }
  0x87   : > { %v339_v11 = vsub.f32 %v326_v0, %v338_v10 }
  0x89   : > { %v340_v12 = vmul.f32 %v339_v11, %v339_v11 }
  0x8b   : > { %v341_v13 = vsel %vm327_vm0, %v340_v12, 0.0 }
  0x8c   : > { %342 = vadd.xlane.f32.xlu0 %v341_v13 }
  0xff   : > { %v343_v16 = vpop.xlane.xlu0 %342 }
 0x100   : > { %v344_v17 = vmul.f32 %v343_v16, %v337_v8 }
 0x102   : > { %v345_v18 = vadd.f32 1e-06, %v344_v17 }
 0x104   : > { %592 = vrsqrt.f32 %v345_v18  ;;  %vm352_vm3 = vweird.f32 %v345_v18 }
 0x10a   : > { %v593_v19 = vpop.eup %592 }
 0x10b   : > { %v347_v20 = vmul.f32 %v593_v19, %v345_v18  ;;  %vm353_vm2 = vweird.f32 %v593_v19 }
 0x10c   : > { %vm354_vm4 = vmor %vm352_vm3, %vm353_vm2 }
 0x10d   : > { %v348_v21 = vmul.f32 %v593_v19, %v347_v20 }
 0x10f   : > { %v349_v23 = vmul.f32 0.5, %v348_v21 }
 0x111   : > { %v350_v25 = vsub.f32 1.5, %v349_v23 }
 0x113   : > { %v351_v26 = vmul.f32 %v593_v19, %v350_v25 }
 0x115   : > { %v355_v28 = vsel %vm354_vm4, %v593_v19, %v351_v26 }
 0x116   : > { %v356_v29 = vmul.f32 %v355_v28, %v339_v11 }
 0x118   : > { %v363_v31 = vmul.f32 %v361_v27, %v356_v29 }
 0x11a   : > { %v367_v32 = vadd.f32 %v588_v30, %v363_v31 }
 0x11c   : > { %v368_v33 = vpack.c.bf16 %v367_v32, %v367_v32 }
 0x11e   : > { %558 = vmatmul.msk.bf16.vlgmr.msra.gmra.mxu0 %vm389_vm5, %v368_v33 }
 0x19b   : > { %v402_v35 = vpop.f32.mrf.mxu0 }
 0x19c   : > { %v403_v36 = vadd.f32 %v589_v34, %v402_v35 }
 0x19e   : > { %407 = vst.msk [vmem:[%s324_s15] sm:$0xf] %vm406_vm6, %v403_v36 }
 0x1a3   : > { %v404_v37 = vpop.f32.mrf.mxu0 }
 0x1a4 PF: > { %s15_s20 = sadd.s32 1, %s616_s20   ;;  %s714_s18 = smov %s612_s19 }
 0x1a5   : > { %p12_p5 = scmp.ge.s32.totalorder %s15_s20, 10   ;;  %s715_s19 = smov %s717_s21 }
 0x1a7   :  { %14 = sbr.rel (!%p12_p5) target bundleno = 2 (0x2), region = 82 }

// kernel: dit_video_forward.22
= control target key start
LH: loop header
LB: loop body
LE: loop exit
PB: predicated region body
PF: predicated region fallthrough
CT: control target
= control target key end

     0   :  { %s352_s6 = smov 0   ;;  %s380_s0 = inlined_call_operand.vmem [shape: f32[8,4,96], index: 0, kind: input, shape index: {}]   ;;  %s381_s1 = inlined_call_operand.vmem [shape: f32[8,4,32], index: 1, kind: output, shape index: {}]  }
   0x1 LB: > { %s293_s7 = sadd.s32 4294967295, %s334_s6   ;;  %p297_p0 = scmp.ge.s32.totalorder %s334_s6, 1  ;;  %s334_s6 = sphi %s352_s6, %s11_s6  }
   0x2   : > { %p86_p1 = scmp.lt.s32.totalorder %s334_s6, 9 }
   0x4   : > { %p87_p2 = pnand %p297_p0, %p86_p1 }
   0x5   : > { %p104_p3 = scmp.lt.s32.totalorder (!%p87_p2), %s293_s7, 7  ;;  %s336_s12 = smov (!%p87_p2), 96  }
   0x6   : > { %90 = sbr.rel (%p87_p2) target bundleno = 754 (0x2f2), region = 24  ;;  %s337_s13 = smov (!%p87_p2), 80  }
   0x7   : > { %s338_s14 = smov (!%p87_p2), 112   ;;  %s339_s15 = smov (!%p87_p2), 48  }
   0x8   : > { %s340_s16 = smov (!%p87_p2), 64   ;;  %s341_s20 = smov (!%p87_p2), 16  }
   0xb   : > { %s383_s7 = smov (!%p104_p3, %s293_s7), 7  ;;  %vm118_vm0 = vcmask 130048   ;;  %vm139_vm1 = vcmask 27648   ;;  %vm158_vm2 = vcmask 1041408   ;;  %vm154_vm3 = vcmask 31744  }
   0xc   : > { %s298_s8 = sshll.u32 %s383_s7, 2  ;;  %vm175_vm4 = vcmask 125952   ;;  %vm238_vm5 = vcmask 257152  }
   0xd   : > { %s107_s11 = scalar_lea.vmem %s380_s0, %s298_s8  ;;  %s111_s19 = scalar_lea.vmem %s381_s1, %s298_s8 }
   0xe   : > { %v113_v0 = vld [vmem:[%s107_s11] sm:$0xf] }
   0xf   : > { %v114_v1 = vpack.c.bf16 %v113_v0, %v113_v0 }
  0x11   : > { %116 = vrot.lane.b32.xlu1 %v114_v1, %s336_s12  ;;  %179 = vrot.lane.b32.xlu0 %v114_v1, %s337_s13 }
  0x19   : > { %177 = vrot.lane.b32.xlu0 %v114_v1, %s338_s14 }
  0x21   : > { %213 = vrot.lane.b32.xlu0 %v114_v1, %s339_s15 }
  0x29   : > { %152 = vrot.lane.b32.xlu0 %v114_v1, %s340_s16 }
  0x83   : > { %v117_v2 = vpop.permute.xlu1 %116  ;;  %v180_v3 = vpop.permute.xlu0 %179 }
  0x84   : > { %v123_v4 = vsel %vm118_vm0, %v117_v2, 0  ;;  %v185_v5 = vsel %vm118_vm0, %v180_v3, 0 }
  0x85   : > { %132 = vmatpush.bf16.xpose.msra.mxu0 %v123_v4  ;;  %194 = vmatpush.bf16.xpose.msra.mxu2 %v185_v5 }
  0x8b   : > { %v178_v6 = vpop.permute.xlu0 %177 }
  0x8c   : > { %300 = vmatmul.msk.bf16.vlgmr.msra.gmra.mxu0 %vm118_vm0, %v114_v1  ;;  %302 = vmatmul.msk.bf16.vlgmr.msra.gmra.mxu2 %vm118_vm0, %v178_v6 }
  0x93   : > { %v214_v25 = vpop.permute.xlu0 %213 }
  0x94   : > { %v219_v26 = vsel %vm158_vm2, %v214_v25, 0 }
  0x95   : > { %228 = vmatpush.bf16.msra.mxu3 %v219_v26 }
  0x9b   : > { %v153_v27 = vpop.permute.xlu0 %152 }
  0x9c   : > { %v160_v28 = vsel %vm158_vm2, %v153_v27, 0 }
  0x9d   : > { %169 = vmatpush.bf16.msra.mxu1 %v160_v28 }
 0x109   : > { %v134_v7 = vpop.f32.mrf.mxu0 }
 0x10a   : > { %v138_v8 = vmul.f32 0.25, %v134_v7 }
 0x10c   : > { %v140_v9 = vsel %vm139_vm1, %v138_v8, -inf }
 0x10d   : > { %141 = vmax.xlane.f32.xlu2 %v140_v9 }
 0x10f   : > { %v196_v10 = vpop.f32.mrf.mxu2 }
 0x110   : > { %v200_v11 = vmul.f32 0.25, %v196_v10 }
 0x111   : > { %v136_v12 = vpop.f32.mrf.mxu0 }
 0x112   : > { %v201_v13 = vsel %vm139_vm1, %v200_v11, -inf }
 0x113   : > { %202 = vmax.xlane.f32.xlu1 %v201_v13 }
 0x117   : > { %v198_v14 = vpop.f32.mrf.mxu2 }
 0x180   : > { %v142_v15 = vpop.xlane.xlu2 %141 }
 0x181   : > { %v143_v18 = vsub.f32 %v138_v8, %v142_v15 }
 0x183   : > { %v144_v20 = vmul.f32 1.442695, %v143_v18 }
 0x186   : > { %v203_v16 = vpop.xlane.xlu1 %202 }
 0x187   : > { %v204_v17 = vsub.f32 %v200_v11, %v203_v16 }
 0x189   : > { %v205_v19 = vmul.f32 1.442695, %v204_v17 }
 0x18b   : > { %320 = vpow2.f32 %v205_v19 }
 0x18c   : > { %322 = vpow2.f32 %v144_v20 }
 0x191   : > { %v321_v21 = vpop.eup %320 }
 0x192   : > { %v207_v22 = vsel %vm139_vm1, %v321_v21, 0.0  ;;  %v323_v23 = vpop.eup %322 }
 0x193   : > { %208 = vadd.xlane.f32.xlu2 %v207_v22  ;;  %v146_v24 = vsel %vm139_vm1, %v323_v23, 0.0 }
 0x19b   : > { %147 = vadd.xlane.f32.xlu2 %v146_v24 }
 0x206   : > { %v209_v29 = vpop.xlane.xlu2 %208 }
 0x207   : > { %324 = vrcp.f32 %v209_v29 }
 0x20d   : > { %v325_v30 = vpop.eup %324 }
 0x20e   : > { %v148_v31 = vpop.xlane.xlu2 %147  ;;  %v211_v32 = vmul.f32 %v325_v30, %v321_v21 }
 0x20f   : > { %326 = vrcp.f32 %v148_v31 }
 0x210   : > { %v212_v33 = vpack.c.bf16 %v211_v32, %v211_v32 }
 0x212   : > { %303 = vmatmul.msk.bf16.vlgmr.msra.gmra.mxu3 %vm154_vm3, %v212_v33 }
 0x215   : > { %v327_v34 = vpop.eup %326 }
 0x216   : > { %v150_v35 = vmul.f32 %v327_v34, %v323_v23 }
 0x218   : > { %v151_v36 = vpack.c.bf16 %v150_v35, %v150_v35 }
 0x21a   : > { %301 = vmatmul.msk.bf16.vlgmr.msra.gmra.mxu1 %vm154_vm3, %v151_v36 }
 0x295   : > { %v230_v37 = vpop.f32.mrf.mxu3 }
 0x296   : > { %235 = vrot.lane.b32.xlu2 %v230_v37, %s341_s20 }
 0x297   : > { %v171_v38 = vpop.f32.mrf.mxu1 }
 0x298   : > { %176 = vst.msk [vmem:[%s111_s19] sm:$0xf] %vm175_vm4, %v171_v38 }
 0x29d   : > { %v232_v39 = vpop.f32.mrf.mxu3 }
 0x29f   : > { %v173_v40 = vpop.f32.mrf.mxu1 }
 0x2f0   : > { %v236_v41 = vpop.permute.xlu2 %235 }
 0x2f1   : > { %239 = vst.msk [vmem:[%s111_s19] sm:$0xf] %vm238_vm5, %v236_v41 }
 0x2f2 PF: > { %s11_s6 = sadd.s32 1, %s334_s6  }
 0x2f3   : > { %p8_p4 = scmp.ge.s32.totalorder %s11_s6, 10  }
 0x2f5   :  { %10 = sbr.rel (!%p8_p4) target bundleno = 1 (0x1), region = 54 }

// kernel: dit_video_forward.23
= control target key start
LH: loop header
LB: loop body
LE: loop exit
PB: predicated region body
PF: predicated region fallthrough
CT: control target
= control target key end

     0   :  { %s717_s18 = smov 0   ;;  %s719_s19 = smov 0   ;;  %s768_s0 = inlined_call_operand.vmem [shape: f32[8,4,32], index: 0, kind: input, shape index: {}]   ;;  %s769_s1 = inlined_call_operand.vmem [shape: bf16[32,32], index: 1, kind: input, shape index: {}]   ;;  %s770_s2 = inlined_call_operand.vmem [shape: f32[1,32], index: 2, kind: input, shape index: {}]   ;;  %s771_s3 = inlined_call_operand.vmem [shape: f32[8,1,32], index: 3, kind: input, shape index: {}]   ;;  %s772_s4 = inlined_call_operand.vmem [shape: f32[8,4,32], index: 4, kind: input, shape index: {}]   ;;  %s773_s5 = inlined_call_operand.vmem [shape: f32[8,4,32], index: 5, kind: output, shape index: {}]  }
   0x1   :  { %s721_s20 = smov 0  }
   0x2 LB: > { %s41_s21 = sadd.s32 1, %s680_s19  ;;  %p618_p0 = scmp.ge.s32.totalorder %s684_s20, 1  ;;  %s684_s20 = sphi %s721_s20, %s15_s20   ;;  %s680_s19 = sphi %s719_s19, %s775_s19   ;;  %s676_s18 = sphi %s717_s18, %s774_s18  }
   0x3   : > { %p43_p1 = scmp.ge.s32.totalorder %s41_s21, 8  ;;  %p282_p2 = scmp.lt.s32.totalorder %s684_s20, 9 }
   0x5   : > { %s777_s21 = smov (%p43_p1, %s41_s21), 0  ;;  %p283_p3 = pnand %p618_p0, %p282_p2 }
   0x6   : > { %p347_p4 = scmp.lt.s32.totalorder (!%p283_p3), %s676_s18, 7 }
   0x7   : > { %286 = sbr.rel (%p283_p3) target bundleno = 163 (0xa3), region = 40 }
   0xc   : > { %v634_v0 = vld [vmem:[%s769_s1 + $0x8] sm:$0xff]  ;;  %vm400_vm0 = vcmask 257024   ;;  %v686_v1 = vmov 0.0   ;;  %v633_v2 = vld [vmem:[%s769_s1] sm:$0xff]  ;;  %s779_s18 = smov (!%p347_p4, %s676_s18), 7  ;;  %vm421_vm1 = vcmask 261120  }
   0xd   : > { %401 = vst.msk [vmem:[#allocation2] sm:$0xf] %vm400_vm0, %v686_v1  ;;  %431 = vmatpush.bf16.msra.mxu0 %v634_v0  ;;  %s619_s26 = sshll.u32 %s779_s18, 2  ;;  %s374_s29 = scalar_lea.vmem %s771_s3, %s779_s18  ;;  %v661_v8 = vld [vmem:[%s770_s2] ss:$0 sm:$0xff] }
   0xe   : > { %s356_s7 = scalar_lea.vmem %s768_s0, %s619_s26  ;;  %s384_s12 = scalar_lea.vmem %s772_s4, %s619_s26  ;;  %v660_v10 = vld [vmem:[%s374_s29] ss:$0 sm:$0xff] }
   0xf   : > { %v403_v3 = vld [vmem:[%s356_s7] sm:$0xf]  ;;  %s394_s15 = scalar_lea.vmem %s773_s5, %s619_s26 }
  0x10   : > { %v404_v4 = vpack.c.bf16 %v403_v3, %v403_v3  ;;  %v451_v13 = vld [vmem:[%s384_s12] sm:$0xf] }
  0x11   : > { %432 = vmatpush.bf16.msra.mxu0 %v633_v2 }
  0x14   : > { %630 = vmatmul.msk.bf16.vlgmr.msra.gmra.mxu0 %vm421_vm1, %v404_v4  ;;  %v402_v5 = vld [vmem:[#allocation2] sm:$0xf] }
  0x91   : > { %v434_v6 = vpop.f32.mrf.mxu0 }
  0x92   : > { %v438_v7 = vadd.f32 %v434_v6, %v402_v5 }
  0x94   : > { %440 = vst.msk [vmem:[#allocation2] sm:$0xf] %vm400_vm0, %v438_v7 }
  0x99   : > { %v436_v9 = vpop.f32.mrf.mxu0 }
  0x9b   : > { %v444_v11 = vld [vmem:[#allocation2] sm:$0xf] }
  0x9c   : > { %v449_v12 = vadd.f32 %v661_v8, %v444_v11 }
  0x9e   : > { %v455_v14 = vmul.f32 %v660_v10, %v449_v12 }
  0xa0   : > { %v456_v15 = vadd.f32 %v455_v14, %v451_v13 }
  0xa2   : > { %457 = vst.msk [vmem:[%s394_s15] sm:$0xf] %vm400_vm0, %v456_v15 }
  0xa3 PF: > { %s15_s20 = sadd.s32 1, %s684_s20   ;;  %s774_s18 = smov %s680_s19 }
  0xa4   : > { %p12_p5 = scmp.ge.s32.totalorder %s15_s20, 10   ;;  %s775_s19 = smov %s777_s21 }
  0xa6   :  { %14 = sbr.rel (!%p12_p5) target bundleno = 2 (0x2), region = 90 }

// kernel: dit_video_forward.24
= control target key start
LH: loop header
LB: loop body
LE: loop exit
PB: predicated region body
PF: predicated region fallthrough
CT: control target
= control target key end

     0   :  { %s659_s18 = smov 0   ;;  %s661_s19 = smov 0   ;;  %s718_s0 = inlined_call_operand.vmem [shape: f32[8,4,32], index: 0, kind: input, shape index: {}]   ;;  %s719_s1 = inlined_call_operand.vmem [shape: f32[8,1,32], index: 1, kind: input, shape index: {}]   ;;  %s720_s2 = inlined_call_operand.vmem [shape: f32[8,1,32], index: 2, kind: input, shape index: {}]   ;;  %s721_s3 = inlined_call_operand.vmem [shape: bf16[32,128], index: 3, kind: input, shape index: {}]   ;;  %s722_s4 = inlined_call_operand.vmem [shape: f32[1,128], index: 4, kind: input, shape index: {}]   ;;  %s723_s5 = inlined_call_operand.vmem [shape: f32[8,4,128], index: 5, kind: output, shape index: {}]  }
   0x1   :  { %s663_s20 = smov 0  }
   0x2 LB: > { %s34_s21 = sadd.s32 1, %s622_s19  ;;  %p555_p0 = scmp.ge.s32.totalorder %s626_s20, 1  ;;  %s626_s20 = sphi %s663_s20, %s15_s20   ;;  %s622_s19 = sphi %s661_s19, %s725_s19   ;;  %s618_s18 = sphi %s659_s18, %s724_s18  }
   0x3   : > { %p36_p1 = scmp.ge.s32.totalorder %s34_s21, 8  ;;  %p247_p2 = scmp.lt.s32.totalorder %s626_s20, 9 }
   0x5   : > { %s727_s21 = smov (%p36_p1, %s34_s21), 0  ;;  %p248_p3 = pnand %p555_p0, %p247_p2 }
   0x6   : > { %p295_p4 = scmp.lt.s32.totalorder (!%p248_p3), %s618_s18, 7 }
   0x7   : > { %251 = sbr.rel (%p248_p3) target bundleno = 438 (0x1b6), region = 40 }
   0xc   : > { %s729_s18 = smov (!%p295_p4, %s618_s18), 7  ;;  %vm327_vm0 = vcmask 257024   ;;  %v628_v2 = vmov 32.0   ;;  %v570_v14 = vld [vmem:[%s721_s3 + $0x8] sm:$0xff]  ;;  %v569_v15 = vld [vmem:[%s721_s3] sm:$0xff]  ;;  %vm389_vm5 = vcmask 261120  }
   0xd   : > { %s556_s22 = sshll.u32 %s729_s18, 2  ;;  %598 = vrcp.f32 %v628_v2  ;;  %s307_s28 = scalar_lea.vmem %s720_s2, %s729_s18  ;;  %399 = vmatpush.bf16.msra.mxu0 %v570_v14  ;;  %v597_v34 = vld [vmem:[%s722_s4] ss:$0 sm:$0xff] }
   0xe   : > { %s301_s25 = scalar_lea.vmem %s718_s0, %s556_s22  ;;  %s304_s10 = scalar_lea.vmem %s719_s1, %s729_s18  ;;  %v596_v30 = vld [vmem:[%s307_s28] ss:$0 sm:$0xff] }
   0xf   : > { %v326_v0 = vld [vmem:[%s301_s25] sm:$0xf]  ;;  %s324_s15 = scalar_lea.vmem %s723_s5, %s556_s22 }
  0x10   : > { %v328_v1 = vsel %vm327_vm0, %v326_v0, 0.0  ;;  %v357_v22 = vld [vmem:[%s304_s10] sm:$0x1] }
  0x11   : > { %329 = vadd.xlane.f32.xlu0 %v328_v1  ;;  %400 = vmatpush.bf16.msra.mxu0 %v569_v15  ;;  %v359_v24 = vadd.f32 1.0, %v357_v22 }
  0x13   : > { %v599_v3 = vpop.eup %598  ;;  %v361_v27 = vperm.slane %v359_v24, 0 }
  0x14   : > { %v332_v4 = vmul.f32 32.0, %v599_v3  ;;  %vm336_vm1 = vweird.f32 %v599_v3 }
  0x16   : > { %v333_v5 = vsub.f32 1.0, %v332_v4 }
  0x18   : > { %v334_v6 = vmul.f32 %v599_v3, %v333_v5 }
  0x1a   : > { %v335_v7 = vadd.f32 %v599_v3, %v334_v6 }
  0x1c   : > { %v337_v8 = vsel %vm336_vm1, %v599_v3, %v335_v7 }
  0x84   : > { %v330_v9 = vpop.xlane.xlu0 %329 }
  0x85   : > { %v338_v10 = vmul.f32 %v337_v8, %v330_v9 }
  0x87   : > { %v339_v11 = vsub.f32 %v326_v0, %v338_v10 }
  0x89   : > { %v340_v12 = vmul.f32 %v339_v11, %v339_v11 }
  0x8b   : > { %v341_v13 = vsel %vm327_vm0, %v340_v12, 0.0 }
  0x8c   : > { %342 = vadd.xlane.f32.xlu0 %v341_v13 }
  0xff   : > { %v343_v16 = vpop.xlane.xlu0 %342 }
 0x100   : > { %v344_v17 = vmul.f32 %v343_v16, %v337_v8 }
 0x102   : > { %v345_v18 = vadd.f32 1e-06, %v344_v17 }
 0x104   : > { %600 = vrsqrt.f32 %v345_v18  ;;  %vm352_vm3 = vweird.f32 %v345_v18 }
 0x10a   : > { %v601_v19 = vpop.eup %600 }
 0x10b   : > { %v347_v20 = vmul.f32 %v601_v19, %v345_v18  ;;  %vm353_vm2 = vweird.f32 %v601_v19 }
 0x10c   : > { %vm354_vm4 = vmor %vm352_vm3, %vm353_vm2 }
 0x10d   : > { %v348_v21 = vmul.f32 %v601_v19, %v347_v20 }
 0x10f   : > { %v349_v23 = vmul.f32 0.5, %v348_v21 }
 0x111   : > { %v350_v25 = vsub.f32 1.5, %v349_v23 }
 0x113   : > { %v351_v26 = vmul.f32 %v601_v19, %v350_v25 }
 0x115   : > { %v355_v28 = vsel %vm354_vm4, %v601_v19, %v351_v26 }
 0x116   : > { %v356_v29 = vmul.f32 %v355_v28, %v339_v11 }
 0x118   : > { %v363_v31 = vmul.f32 %v361_v27, %v356_v29 }
 0x11a   : > { %v367_v32 = vadd.f32 %v596_v30, %v363_v31 }
 0x11c   : > { %v368_v33 = vpack.c.bf16 %v367_v32, %v367_v32 }
 0x11e   : > { %566 = vmatmul.msk.bf16.vlgmr.msra.gmra.mxu0 %vm389_vm5, %v368_v33 }
 0x19b   : > { %v402_v35 = vpop.f32.mrf.mxu0 }
 0x19c   : > { %v403_v36 = vadd.f32 %v597_v34, %v402_v35 }
 0x19e   : > { %v406_v37 = vmul.f32 %v403_v36, %v403_v36 }
 0x1a0   : > { %v407_v38 = vmul.f32 %v406_v37, %v403_v36 }
 0x1a2   : > { %v408_v39 = vmul.f32 0.044715, %v407_v38 }
 0x1a3   : > { %v404_v40 = vpop.f32.mrf.mxu0 }
 0x1a4   : > { %v409_v41 = vadd.f32 %v408_v39, %v403_v36 }
 0x1a6   : > { %v410_v42 = vmul.f32 0.7978846, %v409_v41 }
 0x1a8   : > { %602 = vtanh.f32 %v410_v42 }
 0x1ae   : > { %v603_v43 = vpop.eup %602 }
 0x1af   : > { %v412_v44 = vadd.f32 1.0, %v603_v43 }
 0x1b1   : > { %v413_v45 = vmul.f32 0.5, %v412_v44 }
 0x1b3   : > { %v414_v46 = vmul.f32 %v413_v45, %v403_v36 }
 0x1b5   : > { %415 = vst [vmem:[%s324_s15] sm:$0xf] %v414_v46 }
 0x1b6 PF: > { %s15_s20 = sadd.s32 1, %s626_s20   ;;  %s724_s18 = smov %s622_s19 }
 0x1b7   : > { %p12_p5 = scmp.ge.s32.totalorder %s15_s20, 10   ;;  %s725_s19 = smov %s727_s21 }
 0x1b9   :  { %14 = sbr.rel (!%p12_p5) target bundleno = 2 (0x2), region = 82 }

// kernel: dit_video_forward.25
= control target key start
LH: loop header
LB: loop body
LE: loop exit
PB: predicated region body
PF: predicated region fallthrough
CT: control target
= control target key end

     0   :  { %s789_s18 = smov 0   ;;  %s791_s19 = smov 0   ;;  %s862_s0 = inlined_call_operand.vmem [shape: f32[8,4,128], index: 0, kind: input, shape index: {}]   ;;  %s863_s1 = inlined_call_operand.vmem [shape: bf16[128,32], index: 1, kind: input, shape index: {}]   ;;  %s864_s2 = inlined_call_operand.vmem [shape: f32[1,32], index: 2, kind: input, shape index: {}]   ;;  %s865_s3 = inlined_call_operand.vmem [shape: f32[8,1,32], index: 3, kind: input, shape index: {}]   ;;  %s866_s4 = inlined_call_operand.vmem [shape: f32[8,4,32], index: 4, kind: input, shape index: {}]   ;;  %s867_s5 = inlined_call_operand.vmem [shape: f32[8,4,32], index: 5, kind: output, shape index: {}]  }
   0x1   :  { %s793_s20 = smov 0  }
   0x2 LB: > { %s41_s21 = sadd.s32 1, %s752_s19  ;;  %p661_p0 = scmp.ge.s32.totalorder %s756_s20, 1  ;;  %s756_s20 = sphi %s793_s20, %s15_s20   ;;  %s752_s19 = sphi %s791_s19, %s869_s19   ;;  %s748_s18 = sphi %s789_s18, %s868_s18  }
   0x3   : > { %p43_p1 = scmp.ge.s32.totalorder %s41_s21, 8  ;;  %p282_p2 = scmp.lt.s32.totalorder %s756_s20, 9 }
   0x5   : > { %s871_s21 = smov (%p43_p1, %s41_s21), 0  ;;  %p283_p3 = pnand %p661_p0, %p282_p2 }
   0x6   : > { %p347_p4 = scmp.lt.s32.totalorder (!%p283_p3), %s748_s18, 7 }
   0x7   : > { %286 = sbr.rel (%p283_p3) target bundleno = 187 (0xbb), region = 40 }
   0xc   : > { %v706_v0 = vld [vmem:[%s863_s1 + $0x38] sm:$0xff]  ;;  %vm399_vm0 = vcmask 257024   ;;  %v705_v1 = vld [vmem:[%s863_s1 + $0x30] sm:$0xff]  ;;  %s873_s18 = smov (!%p347_p4, %s748_s18), 7  ;;  %v758_v2 = vmov 0.0   ;;  %v704_v3 = vld [vmem:[%s863_s1 + $0x28] sm:$0xff] }
   0xd   : > { %468 = vmatpush.bf16.msra.mxu0 %v706_v0  ;;  %400 = vst.msk [vmem:[#allocation2] sm:$0xf] %vm399_vm0, %v758_v2  ;;  %s374_s28 = scalar_lea.vmem %s865_s3, %s873_s18  ;;  %v703_v4 = vld [vmem:[%s863_s1 + $0x20] sm:$0xff]  ;;  %v702_v5 = vld [vmem:[%s863_s1 + $0x18] sm:$0xff]  ;;  %v701_v6 = vld [vmem:[%s863_s1 + $0x10] sm:$0xff]  ;;  %s662_s12 = sshll.u32 %s873_s18, 2 }
   0xe   : > { %v700_v7 = vld [vmem:[%s863_s1 + $0x8] sm:$0xff]  ;;  %s356_s17 = scalar_lea.vmem %s862_s0, %s662_s12  ;;  %v699_v8 = vld [vmem:[%s863_s1] sm:$0xff]  ;;  %s384_s27 = scalar_lea.vmem %s866_s4, %s662_s12 }
   0xf   : > { %v402_v9 = vld [vmem:[%s356_s17] sm:$0xf]  ;;  %s394_s6 = scalar_lea.vmem %s867_s5, %s662_s12 }
  0x10   : > { %v403_v10 = vpack.c.bf16 %v402_v9, %v402_v9  ;;  %v733_v14 = vld [vmem:[%s864_s2] ss:$0 sm:$0xff] }
  0x11   : > { %469 = vmatpush.bf16.msra.mxu0 %v705_v1  ;;  %v732_v16 = vld [vmem:[%s374_s28] ss:$0 sm:$0xff] }
  0x12   : > { %v494_v19 = vld [vmem:[%s384_s27] sm:$0xf] }
  0x14   : > { %v401_v11 = vld [vmem:[#allocation2] sm:$0xf] }
  0x15   : > { %470 = vmatpush.bf16.msra.mxu0 %v704_v3 }
  0x19   : > { %471 = vmatpush.bf16.msra.mxu0 %v703_v4 }
  0x1d   : > { %472 = vmatpush.bf16.msra.mxu0 %v702_v5 }
  0x21   : > { %473 = vmatpush.bf16.msra.mxu0 %v701_v6 }
  0x25   : > { %474 = vmatpush.bf16.msra.mxu0 %v700_v7 }
  0x29   : > { %475 = vmatpush.bf16.msra.mxu0 %v699_v8 }
  0x2c   : > { %476 = vmatmul.bf16.vlgmr.msra.gmra.mxu0 %v403_v10 }
  0xa9   : > { %v477_v12 = vpop.f32.mrf.mxu0 }
  0xaa   : > { %v481_v13 = vadd.f32 %v477_v12, %v401_v11 }
  0xac   : > { %483 = vst.msk [vmem:[#allocation2] sm:$0xf] %vm399_vm0, %v481_v13 }
  0xb1   : > { %v479_v15 = vpop.f32.mrf.mxu0 }
  0xb3   : > { %v487_v17 = vld [vmem:[#allocation2] sm:$0xf] }
  0xb4   : > { %v492_v18 = vadd.f32 %v733_v14, %v487_v17 }
  0xb6   : > { %v498_v20 = vmul.f32 %v732_v16, %v492_v18 }
  0xb8   : > { %v499_v21 = vadd.f32 %v498_v20, %v494_v19 }
  0xba   : > { %500 = vst.msk [vmem:[%s394_s6] sm:$0xf] %vm399_vm0, %v499_v21 }
  0xbb PF: > { %s15_s20 = sadd.s32 1, %s756_s20   ;;  %s868_s18 = smov %s752_s19 }
  0xbc   : > { %p12_p5 = scmp.ge.s32.totalorder %s15_s20, 10   ;;  %s869_s19 = smov %s871_s21 }
  0xbe   :  { %14 = sbr.rel (!%p12_p5) target bundleno = 2 (0x2), region = 90 }

// kernel: dit_video_forward.32
= control target key start
LH: loop header
LB: loop body
LE: loop exit
PB: predicated region body
PF: predicated region fallthrough
CT: control target
= control target key end

     0   :  { %vm19_vm0 = vcmask 523264   ;;  %v112_v4 = vmov 0.0   ;;  %vm60_vm5 = vcmask 261120   ;;  %s151_s1 = inlined_call_operand.vmem [shape: bf16[32,64], index: 1, kind: input, shape index: {}]   ;;  %s152_s0 = inlined_call_operand.vmem [shape: f32[8,32], index: 0, kind: input, shape index: {}]   ;;  %s153_s2 = inlined_call_operand.vmem [shape: f32[1,64], index: 2, kind: input, shape index: {}]   ;;  %s154_s3 = inlined_call_operand.vmem [shape: f32[8,64], index: 3, kind: output, shape index: {}]  }
   0x1   :  { %v105_v0 = vld [vmem:[%s151_s1 + $0x8] sm:$0xff]  ;;  %v21_v1 = vld [vmem:[%s152_s0] sm:$0xff]  ;;  %20 = vst.msk [vmem:[#allocation2] sm:$0xff] %vm19_vm0, %v112_v4 }
   0x2   :  { %v94_v2 = vmul.f32 -1.442695, %v21_v1  ;;  %70 = vmatpush.bf16.msra.mxu0 %v105_v0  ;;  %v104_v3 = vld [vmem:[%s151_s1] sm:$0xff] }
   0x3   :  { %v107_v22 = vld [vmem:[%s153_s2] ss:$0 sm:$0xff] }
   0x4   :  { %108 = vpow2.f32 %v94_v2 }
   0x6   :  { %71 = vmatpush.bf16.msra.mxu0 %v104_v3 }
   0x8   :  { %v42_v19 = vld [vmem:[#allocation2] sm:$0xff] }
   0xa   :  { %v109_v5 = vpop.eup %108 }
   0xb   :  { %v25_v6 = vadd.f32 1.0, %v109_v5 }
   0xd   :  { %110 = vrcp.f32 %v25_v6  ;;  %v37_v9 = vand.u32 2147483648, %v25_v6  ;;  %vm31_vm1 = vweird.f32 %v25_v6  ;;  %v35_v11 = vand.u32 2147483647, %v25_v6 }
   0xf   :  { %v38_v13 = vor.u32 1.1754944e-38, %v37_v9  ;;  %vm36_vm4 = vcmp.eq.f32.partialorder %v35_v11, 8.507059e+37 }
  0x13   :  { %v111_v7 = vpop.eup %110 }
  0x14   :  { %v27_v8 = vmul.f32 %v111_v7, %v25_v6  ;;  %vm32_vm2 = vweird.f32 %v111_v7 }
  0x15   :  { %vm33_vm3 = vmor %vm31_vm1, %vm32_vm2 }
  0x16   :  { %v28_v10 = vsub.f32 1.0, %v27_v8 }
  0x18   :  { %v29_v12 = vmul.f32 %v111_v7, %v28_v10 }
  0x1a   :  { %v30_v14 = vadd.f32 %v111_v7, %v29_v12 }
  0x1c   :  { %v34_v15 = vsel %vm33_vm3, %v111_v7, %v30_v14 }
  0x1d   :  { %v39_v16 = vsel %vm36_vm4, %v38_v13, %v34_v15 }
  0x1e   :  { %v41_v17 = vmul.f32 %v39_v16, %v21_v1 }
  0x20   :  { %v43_v18 = vpack.c.bf16 %v41_v17, %v41_v17 }
  0x22   :  { %103 = vmatmul.msk.bf16.vlgmr.msra.gmra.mxu0 %vm60_vm5, %v43_v18 }
  0x9f   :  { %v73_v20 = vpop.f32.mrf.mxu0 }
  0xa0   :  { %v77_v21 = vadd.f32 %v73_v20, %v42_v19 }
  0xa2   :  { %79 = vst.msk [vmem:[#allocation2] sm:$0xff] %vm19_vm0, %v77_v21 }
  0xa7   :  { %v75_v23 = vpop.f32.mrf.mxu0 }
  0xa9   :  { %v83_v24 = vld [vmem:[#allocation2] sm:$0xff] }
  0xaa   :  { %v88_v25 = vadd.f32 %v107_v22, %v83_v24 }
  0xac   :  { %89 = vst.msk [vmem:[%s154_s3] sm:$0xff] %vm19_vm0, %v88_v25 }

// kernel: dit_video_forward.33
= control target key start
LH: loop header
LB: loop body
LE: loop exit
PB: predicated region body
PF: predicated region fallthrough
CT: control target
= control target key end

     0   :  { %s721_s18 = smov 0   ;;  %s723_s19 = smov 0   ;;  %s800_s0 = inlined_call_operand.vmem [shape: f32[8,4,32], index: 0, kind: input, shape index: {}]   ;;  %s801_s1 = inlined_call_operand.vmem [shape: f32[8,1,32], index: 1, kind: input, shape index: {}]   ;;  %s802_s2 = inlined_call_operand.vmem [shape: f32[8,1,32], index: 2, kind: input, shape index: {}]   ;;  %s803_s3 = inlined_call_operand.vmem [shape: bf16[32,256], index: 3, kind: input, shape index: {}]   ;;  %s804_s4 = inlined_call_operand.vmem [shape: f32[1,256], index: 4, kind: input, shape index: {}]   ;;  %s805_s5 = inlined_call_operand.vmem [shape: f32[8,4,256], index: 5, kind: output, shape index: {}]  }
   0x1   :  { %s725_s20 = smov 0  }
   0x2 LB: > { %s34_s21 = sadd.s32 1, %s684_s19  ;;  %p607_p0 = scmp.ge.s32.totalorder %s688_s20, 1  ;;  %s688_s20 = sphi %s725_s20, %s15_s20   ;;  %s684_s19 = sphi %s723_s19, %s807_s19   ;;  %s680_s18 = sphi %s721_s18, %s806_s18  }
   0x3   : > { %p36_p1 = scmp.ge.s32.totalorder %s34_s21, 8  ;;  %p251_p2 = scmp.lt.s32.totalorder %s688_s20, 9 }
   0x5   : > { %s809_s21 = smov (%p36_p1, %s34_s21), 0  ;;  %p252_p3 = pnand %p607_p0, %p251_p2 }
   0x6   : > { %p304_p4 = scmp.lt.s32.totalorder (!%p252_p3), %s680_s18, 7 }
   0x7   : > { %255 = sbr.rel (%p252_p3) target bundleno = 420 (0x1a4), region = 40 }
   0xc   : > { %s811_s18 = smov (!%p304_p4, %s680_s18), 7  ;;  %vm344_vm0 = vcmask 257024   ;;  %v690_v2 = vmov 32.0   ;;  %v621_v14 = vld [vmem:[%s803_s3 + $0x10] sm:$0xf]  ;;  %vm416_vm5 = vcmask 261120  }
   0xd   : > { %s608_s22 = sshll.u32 %s811_s18, 2  ;;  %662 = vrcp.f32 %v690_v2  ;;  %s316_s28 = scalar_lea.vmem %s802_s2, %s811_s18  ;;  %v635_v15 = vld [vmem:[%s803_s3 + $0x14] sm:$0xf0]  ;;  %v634_v16 = vld [vmem:[%s803_s3 + $0x14] sm:$0xf]  ;;  %vm449_vm6 = vcmask 1043456  }
   0xe   : > { %s310_s25 = scalar_lea.vmem %s800_s0, %s608_s22  ;;  %v622_v17 = vor.u32 %v635_v15, %v621_v14  ;;  %v623_v18 = vld [vmem:[%s803_s3 + $0x18] sm:$0xf0]  ;;  %v613_v19 = vld [vmem:[%s803_s3] sm:$0xf]  ;;  %v633_v20 = vld [vmem:[%s803_s3 + $0x4] sm:$0xf0]  ;;  %s313_s26 = scalar_lea.vmem %s801_s1, %s811_s18 }
   0xf   : > { %v343_v0 = vld [vmem:[%s310_s25] sm:$0xf]  ;;  %v626_v21 = vor.u32 %v634_v16, %v623_v18  ;;  %v632_v22 = vld [vmem:[%s803_s3 + $0x4] sm:$0xf]  ;;  %v615_v23 = vld [vmem:[%s803_s3 + $0x8] sm:$0xf0]  ;;  %v614_v24 = vor.u32 %v633_v20, %v613_v19 }
  0x10   : > { %v345_v1 = vsel %vm344_vm0, %v343_v0, 0.0  ;;  %426 = vmatpush.bf16.msra.mxu0 %v622_v17  ;;  %v618_v25 = vor.u32 %v632_v22, %v615_v23  ;;  %v374_v32 = vld [vmem:[%s313_s26] sm:$0x1]  ;;  %s631_s7 = sshll.u32 %s811_s18, 3 }
  0x11   : > { %346 = vadd.xlane.f32.xlu0 %v345_v1  ;;  %439 = vmatpush.bf16.msra.mxu1 %v626_v21  ;;  %v376_v34 = vadd.f32 1.0, %v374_v32  ;;  %v661_v40 = vld [vmem:[%s316_s28] ss:$0 sm:$0xff]  ;;  %s340_s9 = scalar_lea.vmem %s805_s5, %s631_s7 }
  0x12   : > { %v390_v44 = vld [vmem:[%s804_s4] sm:$0x3] }
  0x13   : > { %v663_v3 = vpop.eup %662  ;;  %v378_v37 = vperm.slane %v376_v34, 0  ;;  %v393_v45 = vperm.slane %v390_v44, 1  ;;  %v392_v46 = vperm.slane %v390_v44, 0 }
  0x14   : > { %v349_v4 = vmul.f32 32.0, %v663_v3  ;;  %vm353_vm1 = vweird.f32 %v663_v3  ;;  %427 = vmatpush.bf16.msra.mxu0 %v614_v24 }
  0x15   : > { %440 = vmatpush.bf16.msra.mxu1 %v618_v25 }
  0x16   : > { %v350_v5 = vsub.f32 1.0, %v349_v4 }
  0x18   : > { %v351_v6 = vmul.f32 %v663_v3, %v350_v5 }
  0x1a   : > { %v352_v7 = vadd.f32 %v663_v3, %v351_v6 }
  0x1c   : > { %v354_v8 = vsel %vm353_vm1, %v663_v3, %v352_v7 }
  0x84   : > { %v347_v9 = vpop.xlane.xlu0 %346 }
  0x85   : > { %v355_v10 = vmul.f32 %v354_v8, %v347_v9 }
  0x87   : > { %v356_v11 = vsub.f32 %v343_v0, %v355_v10 }
  0x89   : > { %v357_v12 = vmul.f32 %v356_v11, %v356_v11 }
  0x8b   : > { %v358_v13 = vsel %vm344_vm0, %v357_v12, 0.0 }
  0x8c   : > { %359 = vadd.xlane.f32.xlu0 %v358_v13 }
  0xff   : > { %v360_v26 = vpop.xlane.xlu0 %359 }
 0x100   : > { %v361_v27 = vmul.f32 %v360_v26, %v354_v8 }
 0x102   : > { %v362_v28 = vadd.f32 1e-06, %v361_v27 }
 0x104   : > { %664 = vrsqrt.f32 %v362_v28  ;;  %vm369_vm3 = vweird.f32 %v362_v28 }
 0x10a   : > { %v665_v29 = vpop.eup %664 }
 0x10b   : > { %v364_v30 = vmul.f32 %v665_v29, %v362_v28  ;;  %vm370_vm2 = vweird.f32 %v665_v29 }
 0x10c   : > { %vm371_vm4 = vmor %vm369_vm3, %vm370_vm2 }
 0x10d   : > { %v365_v31 = vmul.f32 %v665_v29, %v364_v30 }
 0x10f   : > { %v366_v33 = vmul.f32 0.5, %v365_v31 }
 0x111   : > { %v367_v35 = vsub.f32 1.5, %v366_v33 }
 0x113   : > { %v368_v36 = vmul.f32 %v665_v29, %v367_v35 }
 0x115   : > { %v372_v38 = vsel %vm371_vm4, %v665_v29, %v368_v36 }
 0x116   : > { %v373_v39 = vmul.f32 %v372_v38, %v356_v11 }
 0x118   : > { %v380_v41 = vmul.f32 %v378_v37, %v373_v39 }
 0x11a   : > { %v384_v42 = vadd.f32 %v661_v40, %v380_v41 }
 0x11c   : > { %v385_v43 = vpack.c.bf16 %v384_v42, %v384_v42 }
 0x11e   : > { %627 = vmatmul.msk.bf16.vlgmr.msra.gmra.mxu0 %vm416_vm5, %v385_v43  ;;  %628 = vmatmul.msk.bf16.vlgmr.msra.gmra.mxu1 %vm416_vm5, %v385_v43 }
 0x19b   : > { %v429_v47 = vpop.f32.mrf.mxu0  ;;  %v442_v48 = vpop.f32.mrf.mxu1 }
 0x19c   : > { %v443_v49 = vadd.f32 %v442_v48, %v393_v45  ;;  %v430_v50 = vadd.f32 %v429_v47, %v392_v46 }
 0x19e   : > { %v448_v51 = vrot.slane %v443_v49, 4 }
 0x1a0   : > { %v450_v52 = vsel %vm449_vm6, %v430_v50, %v448_v51 }
 0x1a1   : > { %452 = vst [vmem:[%s340_s9] sm:$0xff] %v450_v52 }
 0x1a3   : > { %v431_v53 = vpop.f32.mrf.mxu0  ;;  %v444_v54 = vpop.f32.mrf.mxu1 }
 0x1a4 PF: > { %s15_s20 = sadd.s32 1, %s688_s20   ;;  %s806_s18 = smov %s684_s19 }
 0x1a5   : > { %p12_p5 = scmp.ge.s32.totalorder %s15_s20, 10   ;;  %s807_s19 = smov %s809_s21 }
 0x1a7   :  { %14 = sbr.rel (!%p12_p5) target bundleno = 2 (0x2), region = 82 }

</bundles_post_ra>
